<compile_context>
chip_gen: v7x
topology: tpu7x:2x2x1
jax: 0.10.0
libtpu: 0.0.40
codegen_flags: <defaults>
</compile_context>

<pallas_src>
import math

import jax
import jax.numpy as jnp
from jax.experimental import pallas as pl
from jax.experimental.pallas import tpu as pltpu


def decoder_forward_ref(feats):
    """Pure-JAX reference mirroring the einops chain in the PyTorch module."""
    B, C, H, W = feats.shape
    C4 = C // 4
    xr = feats.reshape(B, C4, 2, 2, H // 2, 2, W // 2, 2)   # b c hn wn hd hh wd ww
    out = jnp.transpose(xr, (0, 1, 4, 2, 5, 6, 3, 7))       # b c hd hn hh wd wn ww
    return out.reshape(B, C4, 2 * H, 2 * W)


def _make_shuffle_kernel(W: int, chunk: int, per_segment: bool):
    """Kernel mapping (NB, 4, TH, 2W) input blocks to (NB, TH, 8W) output blocks."""

    n_chunks = W // chunk

    def build_levels(length):
        # Static per-level lane masks for the fine interleave rounds (computed once).
        lane = jax.lax.broadcasted_iota(jnp.int32, (1, 1, length), 2)
        levels = []
        g = chunk
        while g >= 4:
            s = g // 2
            q = lane % (2 * g)
            take_fwd = (q >= s) & (q < g)        # out[d] = x[d + s]
            take_bwd = (q >= g) & (q < g + s)    # out[d] = x[d - s]
            levels.append((s, take_fwd, take_bwd))
            g //= 2
        return levels

    def riffle(x, levels):
        # x holds alternating `chunk`-wide blocks of (a, b); finish the riffle down to
        # pair (2-element) granularity.  pltpu.roll follows np.roll semantics:
        # roll(x, s)[d] = x[(d - s) % L].
        length = x.shape[-1]
        axis = x.ndim - 1
        for s, take_fwd, take_bwd in levels:
            x_fwd = pltpu.roll(x, length - s, axis)   # x[(d + s) % L]
            x_bwd = pltpu.roll(x, s, axis)            # x[(d - s) % L]
            x = jnp.where(take_fwd, x_fwd, jnp.where(take_bwd, x_bwd, x))
        return x

    def gather_pieces(x_ref, hn, hh):
        # Alternating `chunk`-wide slices of a (wn=0) and b (wn=1).  For W % 128 == 0
        # every slice is 128-lane aligned, so this realizes all coarse interleave
        # levels as plain vreg-granular copies (no XLU rotations).
        pieces = []
        for c in range(n_chunks):
            base = hh * W + c * chunk
            pieces.append(x_ref[:, 2 * hn, :, base:base + chunk])
            pieces.append(x_ref[:, 2 * hn + 1, :, base:base + chunk])
        return pieces

    if per_segment:
        # 2W is a multiple of 128: process the four (hn, hh) segments separately; every
        # store is lane-aligned and lane-dense.
        def kernel(x_ref, o_ref):
            two_w = 2 * W
            levels = build_levels(two_w)
            for hn in range(2):
                for hh in range(2):
                    seg = jnp.concatenate(gather_pieces(x_ref, hn, hh), axis=-1)
                    seg = riffle(seg, levels)
                    off = (2 * hn + hh) * two_w
                    o_ref[:, :, off:off + two_w] = seg
    else:
        # Small W: assemble the full 8W output row and issue one lane-dense store
        # (8W is a multiple of 128) instead of four masked partial stores.
        def kernel(x_ref, o_ref):
            levels = build_levels(8 * W)
            pieces = []
            for hn in range(2):
                for hh in range(2):
                    pieces.extend(gather_pieces(x_ref, hn, hh))
            o_ref[...] = riffle(jnp.concatenate(pieces, axis=-1), levels)

    return kernel


def _choose_blocks(N, Hh, W, itemsize, target_bytes=2 << 20, min_steps=8):
    """Pick (NB, TH): ~target_bytes per (in or out) block (x4 with double-buffering),
    second-minor block dim a whole sublane tile (or the full axis), and enough grid
    steps for megacore sharding + software pipelining."""
    row_bytes = 8 * W * itemsize               # one hd-row of one n (in block == out block)
    sub = max(8, 32 // itemsize)               # sublane tile: 8 (f32) / 16 (bf16) / 32 (i8)

    th = min(Hh, max(1, target_bytes // row_bytes))
    if th < Hh:
        th = max(min(sub, Hh), (th // sub) * sub)
    nb = min(N, max(1, target_bytes // (th * row_bytes)))

    def steps(nb_, th_):
        return math.ceil(N / nb_) * math.ceil(Hh / th_)

    # v7x has two TensorCores and the pipeline needs >1 step to overlap DMA with compute.
    while nb > 1 and steps(nb, th) < min_steps:
        nb = (nb + 1) // 2
    while th > sub and steps(nb, th) < min_steps:
        new_th = max(sub, ((th // 2) // sub) * sub)
        if new_th >= th:
            break
        th = new_th
    return int(nb), int(th)


@jax.jit
def decoder_forward(feats):
    """Pallas implementation of Decoder.forward (Upsample(2)), NCHW in / NCHW out."""
    B, C, H, W = feats.shape
    assert C % 4 == 0 and H % 2 == 0 and W % 2 == 0, (B, C, H, W)
    C4, Hh = C // 4, H // 2

    if W % 16 != 0:
        # TODO(synk): lane interleave below 16-lane chunk granularity isn't worth a
        # kernel; tiny/irregular W falls back to the XLA reshape+transpose reference.
        return decoder_forward_ref(feats)

    N = B * C4
    x_in = feats.reshape(N, 4, Hh, 2 * W)      # free, order-preserving view

    chunk = min(W & (-W), 128)                 # largest power-of-two divisor of W, <= 128
    per_segment = (W % 64 == 0)                # 2W % 128 == 0 -> aligned per-segment stores

    itemsize = jnp.dtype(feats.dtype).itemsize
    NB, TH = _choose_blocks(N, Hh, W, itemsize)
    grid = (pl.cdiv(N, NB), pl.cdiv(Hh, TH))

    out = pl.pallas_call(
        _make_shuffle_kernel(W, chunk, per_segment),
        out_shape=jax.ShapeDtypeStruct((N, Hh, 8 * W), feats.dtype),
        grid=grid,
        in_specs=[pl.BlockSpec((NB, 4, TH, 2 * W), lambda i, j: (i, 0, j, 0))],
        out_specs=pl.BlockSpec((NB, TH, 8 * W), lambda i, j: (i, j, 0)),
        compiler_params=pltpu.CompilerParams(
            dimension_semantics=("parallel", "parallel"),
            vmem_limit_bytes=32 * 1024 * 1024,
        ),
    )(x_in)

    # TODO(synk): for bf16/fp16 inputs, pltpu.bitcast the contiguous (2*wd+ww) pairs
    # into u32 lanes before the interleave (halves lane work, drops one level).
    return out.reshape(B, C4, 2 * H, 2 * W)    # free view back to NCHW


if __name__ == "__main__":
    # Decoder has no learnable parameters; it is the fixed dilation-2 pixel shuffler.
    key = jax.random.PRNGKey(0)
    cases = [
        ((2, 8, 16, 128), jnp.float32),   # fast path: 128-chunk init, per-segment stores
        ((2, 8, 16, 16), jnp.float32),    # small-W path: single full-row lane-dense store
        ((1, 4, 40, 64), jnp.float32),    # ragged Hh blocks (20 rows -> 8 + 8 + 4)
        ((2, 4, 16, 128), jnp.bfloat16),  # 16-bit dtype
        ((2, 4, 6, 6), jnp.float32),      # W % 16 != 0 -> XLA reference fallback
    ]
    for shape, dtype in cases:
        key, k = jax.random.split(key)
        x = jax.random.normal(k, shape, dtype=jnp.float32).astype(dtype)
        out = jax.block_until_ready(decoder_forward(x))
        ref = decoder_forward_ref(x)
        B, C, H, W = shape
        assert out.shape == (B, C // 4, 2 * H, 2 * W), (shape, out.shape)
        assert bool(jnp.array_equal(out, ref)), f"mismatch for shape={shape} dtype={dtype}"
    print("KERNEL_OK")
</pallas_src>

<mosaic_0001>
module attributes {stable_mosaic.version = 11 : i64} {
  func.func @kernel(%arg0: i32, %arg1: i32, %arg2: memref<1x4x8x256xf32, #tpu.memory_space<vmem>>, %arg3: memref<1x8x1024xf32, #tpu.memory_space<vmem>>) attributes {dimension_semantics = [#tpu.dimension_semantics<parallel>, #tpu.dimension_semantics<parallel>], iteration_bounds = array<i64: 4, 1>, scalar_prefetch = 0 : i64, scratch_operands = 0 : i64, tpu.core_type = #tpu.core_type<tc>, window_params = [{transform_indices = @transform_0, window_bounds = array<i64: 1, 4, 8, 256>}, {transform_indices = @transform_1, window_bounds = array<i64: 1, 8, 1024>}]} {
    %0 = tpu.iota {dimensions = array<i32: 2>} : vector<1x1x256xi32>
    %c256_i32 = arith.constant 256 : i32
    %c0_i32 = arith.constant 0 : i32
    %1 = arith.cmpi eq, %c256_i32, %c0_i32 : i32
    %c1_i32 = arith.constant 1 : i32
    %2 = arith.select %1, %c1_i32, %c256_i32 : i32
    %3 = vector.broadcast %2 : i32 to vector<1x1x256xi32>
    %4 = arith.remsi %0, %3 : vector<1x1x256xi32>
    %c0_i32_0 = arith.constant 0 : i32
    %5 = vector.broadcast %c0_i32_0 : i32 to vector<1x1x256xi32>
    %6 = arith.cmpi ne, %4, %5 : vector<1x1x256xi32>
    %c0_i32_1 = arith.constant 0 : i32
    %7 = vector.broadcast %c0_i32_1 : i32 to vector<1x1x256xi32>
    %8 = arith.cmpi slt, %4, %7 : vector<1x1x256xi32>
    %c0_i32_2 = arith.constant 0 : i32
    %9 = arith.cmpi slt, %2, %c0_i32_2 : i32
    %10 = vector.broadcast %9 : i1 to vector<1x1x256xi1>
    %11 = vector.broadcast %10 : vector<1x1x256xi1> to vector<1x1x256xi1>
    %12 = arith.xori %8, %11 : vector<1x1x256xi1>
    %13 = arith.andi %12, %6 : vector<1x1x256xi1>
    %14 = vector.broadcast %2 : i32 to vector<1x1x256xi32>
    %15 = arith.addi %4, %14 : vector<1x1x256xi32>
    %16 = arith.select %13, %15, %4 : vector<1x1x256xi1>, vector<1x1x256xi32>
    %c64_i32 = arith.constant 64 : i32
    %17 = vector.broadcast %c64_i32 : i32 to vector<1x1x256xi32>
    %18 = arith.cmpi sge, %16, %17 : vector<1x1x256xi32>
    %c128_i32 = arith.constant 128 : i32
    %19 = vector.broadcast %c128_i32 : i32 to vector<1x1x256xi32>
    %20 = arith.cmpi slt, %16, %19 : vector<1x1x256xi32>
    %21 = arith.andi %18, %20 : vector<1x1x256xi1>
    %c128_i32_3 = arith.constant 128 : i32
    %22 = vector.broadcast %c128_i32_3 : i32 to vector<1x1x256xi32>
    %23 = arith.cmpi sge, %16, %22 : vector<1x1x256xi32>
    %c192_i32 = arith.constant 192 : i32
    %24 = vector.broadcast %c192_i32 : i32 to vector<1x1x256xi32>
    %25 = arith.cmpi slt, %16, %24 : vector<1x1x256xi32>
    %26 = arith.andi %23, %25 : vector<1x1x256xi1>
    %c128_i32_4 = arith.constant 128 : i32
    %c0_i32_5 = arith.constant 0 : i32
    %27 = arith.cmpi eq, %c128_i32_4, %c0_i32_5 : i32
    %c1_i32_6 = arith.constant 1 : i32
    %28 = arith.select %27, %c1_i32_6, %c128_i32_4 : i32
    %29 = vector.broadcast %28 : i32 to vector<1x1x256xi32>
    %30 = arith.remsi %0, %29 : vector<1x1x256xi32>
    %c0_i32_7 = arith.constant 0 : i32
    %31 = vector.broadcast %c0_i32_7 : i32 to vector<1x1x256xi32>
    %32 = arith.cmpi ne, %30, %31 : vector<1x1x256xi32>
    %c0_i32_8 = arith.constant 0 : i32
    %33 = vector.broadcast %c0_i32_8 : i32 to vector<1x1x256xi32>
    %34 = arith.cmpi slt, %30, %33 : vector<1x1x256xi32>
    %c0_i32_9 = arith.constant 0 : i32
    %35 = arith.cmpi slt, %28, %c0_i32_9 : i32
    %36 = vector.broadcast %35 : i1 to vector<1x1x256xi1>
    %37 = vector.broadcast %36 : vector<1x1x256xi1> to vector<1x1x256xi1>
    %38 = arith.xori %34, %37 : vector<1x1x256xi1>
    %39 = arith.andi %38, %32 : vector<1x1x256xi1>
    %40 = vector.broadcast %28 : i32 to vector<1x1x256xi32>
    %41 = arith.addi %30, %40 : vector<1x1x256xi32>
    %42 = arith.select %39, %41, %30 : vector<1x1x256xi1>, vector<1x1x256xi32>
    %c32_i32 = arith.constant 32 : i32
    %43 = vector.broadcast %c32_i32 : i32 to vector<1x1x256xi32>
    %44 = arith.cmpi sge, %42, %43 : vector<1x1x256xi32>
    %c64_i32_10 = arith.constant 64 : i32
    %45 = vector.broadcast %c64_i32_10 : i32 to vector<1x1x256xi32>
    %46 = arith.cmpi slt, %42, %45 : vector<1x1x256xi32>
    %47 = arith.andi %44, %46 : vector<1x1x256xi1>
    %c64_i32_11 = arith.constant 64 : i32
    %48 = vector.broadcast %c64_i32_11 : i32 to vector<1x1x256xi32>
    %49 = arith.cmpi sge, %42, %48 : vector<1x1x256xi32>
    %c96_i32 = arith.constant 96 : i32
    %50 = vector.broadcast %c96_i32 : i32 to vector<1x1x256xi32>
    %51 = arith.cmpi slt, %42, %50 : vector<1x1x256xi32>
    %52 = arith.andi %49, %51 : vector<1x1x256xi1>
    %c64_i32_12 = arith.constant 64 : i32
    %c0_i32_13 = arith.constant 0 : i32
    %53 = arith.cmpi eq, %c64_i32_12, %c0_i32_13 : i32
    %c1_i32_14 = arith.constant 1 : i32
    %54 = arith.select %53, %c1_i32_14, %c64_i32_12 : i32
    %55 = vector.broadcast %54 : i32 to vector<1x1x256xi32>
    %56 = arith.remsi %0, %55 : vector<1x1x256xi32>
    %c0_i32_15 = arith.constant 0 : i32
    %57 = vector.broadcast %c0_i32_15 : i32 to vector<1x1x256xi32>
    %58 = arith.cmpi ne, %56, %57 : vector<1x1x256xi32>
    %c0_i32_16 = arith.constant 0 : i32
    %59 = vector.broadcast %c0_i32_16 : i32 to vector<1x1x256xi32>
    %60 = arith.cmpi slt, %56, %59 : vector<1x1x256xi32>
    %c0_i32_17 = arith.constant 0 : i32
    %61 = arith.cmpi slt, %54, %c0_i32_17 : i32
    %62 = vector.broadcast %61 : i1 to vector<1x1x256xi1>
    %63 = vector.broadcast %62 : vector<1x1x256xi1> to vector<1x1x256xi1>
    %64 = arith.xori %60, %63 : vector<1x1x256xi1>
    %65 = arith.andi %64, %58 : vector<1x1x256xi1>
    %66 = vector.broadcast %54 : i32 to vector<1x1x256xi32>
    %67 = arith.addi %56, %66 : vector<1x1x256xi32>
    %68 = arith.select %65, %67, %56 : vector<1x1x256xi1>, vector<1x1x256xi32>
    %c16_i32 = arith.constant 16 : i32
    %69 = vector.broadcast %c16_i32 : i32 to vector<1x1x256xi32>
    %70 = arith.cmpi sge, %68, %69 : vector<1x1x256xi32>
    %c32_i32_18 = arith.constant 32 : i32
    %71 = vector.broadcast %c32_i32_18 : i32 to vector<1x1x256xi32>
    %72 = arith.cmpi slt, %68, %71 : vector<1x1x256xi32>
    %73 = arith.andi %70, %72 : vector<1x1x256xi1>
    %c32_i32_19 = arith.constant 32 : i32
    %74 = vector.broadcast %c32_i32_19 : i32 to vector<1x1x256xi32>
    %75 = arith.cmpi sge, %68, %74 : vector<1x1x256xi32>
    %c48_i32 = arith.constant 48 : i32
    %76 = vector.broadcast %c48_i32 : i32 to vector<1x1x256xi32>
    %77 = arith.cmpi slt, %68, %76 : vector<1x1x256xi32>
    %78 = arith.andi %75, %77 : vector<1x1x256xi1>
    %c32_i32_20 = arith.constant 32 : i32
    %c0_i32_21 = arith.constant 0 : i32
    %79 = arith.cmpi eq, %c32_i32_20, %c0_i32_21 : i32
    %c1_i32_22 = arith.constant 1 : i32
    %80 = arith.select %79, %c1_i32_22, %c32_i32_20 : i32
    %81 = vector.broadcast %80 : i32 to vector<1x1x256xi32>
    %82 = arith.remsi %0, %81 : vector<1x1x256xi32>
    %c0_i32_23 = arith.constant 0 : i32
    %83 = vector.broadcast %c0_i32_23 : i32 to vector<1x1x256xi32>
    %84 = arith.cmpi ne, %82, %83 : vector<1x1x256xi32>
    %c0_i32_24 = arith.constant 0 : i32
    %85 = vector.broadcast %c0_i32_24 : i32 to vector<1x1x256xi32>
    %86 = arith.cmpi slt, %82, %85 : vector<1x1x256xi32>
    %c0_i32_25 = arith.constant 0 : i32
    %87 = arith.cmpi slt, %80, %c0_i32_25 : i32
    %88 = vector.broadcast %87 : i1 to vector<1x1x256xi1>
    %89 = vector.broadcast %88 : vector<1x1x256xi1> to vector<1x1x256xi1>
    %90 = arith.xori %86, %89 : vector<1x1x256xi1>
    %91 = arith.andi %90, %84 : vector<1x1x256xi1>
    %92 = vector.broadcast %80 : i32 to vector<1x1x256xi32>
    %93 = arith.addi %82, %92 : vector<1x1x256xi32>
    %94 = arith.select %91, %93, %82 : vector<1x1x256xi1>, vector<1x1x256xi32>
    %c8_i32 = arith.constant 8 : i32
    %95 = vector.broadcast %c8_i32 : i32 to vector<1x1x256xi32>
    %96 = arith.cmpi sge, %94, %95 : vector<1x1x256xi32>
    %c16_i32_26 = arith.constant 16 : i32
    %97 = vector.broadcast %c16_i32_26 : i32 to vector<1x1x256xi32>
    %98 = arith.cmpi slt, %94, %97 : vector<1x1x256xi32>
    %99 = arith.andi %96, %98 : vector<1x1x256xi1>
    %c16_i32_27 = arith.constant 16 : i32
    %100 = vector.broadcast %c16_i32_27 : i32 to vector<1x1x256xi32>
    %101 = arith.cmpi sge, %94, %100 : vector<1x1x256xi32>
    %c24_i32 = arith.constant 24 : i32
    %102 = vector.broadcast %c24_i32 : i32 to vector<1x1x256xi32>
    %103 = arith.cmpi slt, %94, %102 : vector<1x1x256xi32>
    %104 = arith.andi %101, %103 : vector<1x1x256xi1>
    %c16_i32_28 = arith.constant 16 : i32
    %c0_i32_29 = arith.constant 0 : i32
    %105 = arith.cmpi eq, %c16_i32_28, %c0_i32_29 : i32
    %c1_i32_30 = arith.constant 1 : i32
    %106 = arith.select %105, %c1_i32_30, %c16_i32_28 : i32
    %107 = vector.broadcast %106 : i32 to vector<1x1x256xi32>
    %108 = arith.remsi %0, %107 : vector<1x1x256xi32>
    %c0_i32_31 = arith.constant 0 : i32
    %109 = vector.broadcast %c0_i32_31 : i32 to vector<1x1x256xi32>
    %110 = arith.cmpi ne, %108, %109 : vector<1x1x256xi32>
    %c0_i32_32 = arith.constant 0 : i32
    %111 = vector.broadcast %c0_i32_32 : i32 to vector<1x1x256xi32>
    %112 = arith.cmpi slt, %108, %111 : vector<1x1x256xi32>
    %c0_i32_33 = arith.constant 0 : i32
    %113 = arith.cmpi slt, %106, %c0_i32_33 : i32
    %114 = vector.broadcast %113 : i1 to vector<1x1x256xi1>
    %115 = vector.broadcast %114 : vector<1x1x256xi1> to vector<1x1x256xi1>
    %116 = arith.xori %112, %115 : vector<1x1x256xi1>
    %117 = arith.andi %116, %110 : vector<1x1x256xi1>
    %118 = vector.broadcast %106 : i32 to vector<1x1x256xi32>
    %119 = arith.addi %108, %118 : vector<1x1x256xi32>
    %120 = arith.select %117, %119, %108 : vector<1x1x256xi1>, vector<1x1x256xi32>
    %c4_i32 = arith.constant 4 : i32
    %121 = vector.broadcast %c4_i32 : i32 to vector<1x1x256xi32>
    %122 = arith.cmpi sge, %120, %121 : vector<1x1x256xi32>
    %c8_i32_34 = arith.constant 8 : i32
    %123 = vector.broadcast %c8_i32_34 : i32 to vector<1x1x256xi32>
    %124 = arith.cmpi slt, %120, %123 : vector<1x1x256xi32>
    %125 = arith.andi %122, %124 : vector<1x1x256xi1>
    %c8_i32_35 = arith.constant 8 : i32
    %126 = vector.broadcast %c8_i32_35 : i32 to vector<1x1x256xi32>
    %127 = arith.cmpi sge, %120, %126 : vector<1x1x256xi32>
    %c12_i32 = arith.constant 12 : i32
    %128 = vector.broadcast %c12_i32 : i32 to vector<1x1x256xi32>
    %129 = arith.cmpi slt, %120, %128 : vector<1x1x256xi32>
    %130 = arith.andi %127, %129 : vector<1x1x256xi1>
    %c8_i32_36 = arith.constant 8 : i32
    %c0_i32_37 = arith.constant 0 : i32
    %131 = arith.cmpi eq, %c8_i32_36, %c0_i32_37 : i32
    %c1_i32_38 = arith.constant 1 : i32
    %132 = arith.select %131, %c1_i32_38, %c8_i32_36 : i32
    %133 = vector.broadcast %132 : i32 to vector<1x1x256xi32>
    %134 = arith.remsi %0, %133 : vector<1x1x256xi32>
    %c0_i32_39 = arith.constant 0 : i32
    %135 = vector.broadcast %c0_i32_39 : i32 to vector<1x1x256xi32>
    %136 = arith.cmpi ne, %134, %135 : vector<1x1x256xi32>
    %c0_i32_40 = arith.constant 0 : i32
    %137 = vector.broadcast %c0_i32_40 : i32 to vector<1x1x256xi32>
    %138 = arith.cmpi slt, %134, %137 : vector<1x1x256xi32>
    %c0_i32_41 = arith.constant 0 : i32
    %139 = arith.cmpi slt, %132, %c0_i32_41 : i32
    %140 = vector.broadcast %139 : i1 to vector<1x1x256xi1>
    %141 = vector.broadcast %140 : vector<1x1x256xi1> to vector<1x1x256xi1>
    %142 = arith.xori %138, %141 : vector<1x1x256xi1>
    %143 = arith.andi %142, %136 : vector<1x1x256xi1>
    %144 = vector.broadcast %132 : i32 to vector<1x1x256xi32>
    %145 = arith.addi %134, %144 : vector<1x1x256xi32>
    %146 = arith.select %143, %145, %134 : vector<1x1x256xi1>, vector<1x1x256xi32>
    %c2_i32 = arith.constant 2 : i32
    %147 = vector.broadcast %c2_i32 : i32 to vector<1x1x256xi32>
    %148 = arith.cmpi sge, %146, %147 : vector<1x1x256xi32>
    %c4_i32_42 = arith.constant 4 : i32
    %149 = vector.broadcast %c4_i32_42 : i32 to vector<1x1x256xi32>
    %150 = arith.cmpi slt, %146, %149 : vector<1x1x256xi32>
    %151 = arith.andi %148, %150 : vector<1x1x256xi1>
    %c4_i32_43 = arith.constant 4 : i32
    %152 = vector.broadcast %c4_i32_43 : i32 to vector<1x1x256xi32>
    %153 = arith.cmpi sge, %146, %152 : vector<1x1x256xi32>
    %c6_i32 = arith.constant 6 : i32
    %154 = vector.broadcast %c6_i32 : i32 to vector<1x1x256xi32>
    %155 = arith.cmpi slt, %146, %154 : vector<1x1x256xi32>
    %156 = arith.andi %153, %155 : vector<1x1x256xi1>
    %c0 = arith.constant 0 : index
    %c0_44 = arith.constant 0 : index
    %c0_45 = arith.constant 0 : index
    %c0_46 = arith.constant 0 : index
    %157 = vector.load %arg2[%c0, %c0_44, %c0_45, %c0_46] : memref<1x4x8x256xf32, #tpu.memory_space<vmem>>, vector<1x1x8x128xf32>
    %158 = vector.shape_cast %157 : vector<1x1x8x128xf32> to vector<1x8x128xf32>
    %c0_47 = arith.constant 0 : index
    %c1 = arith.constant 1 : index
    %c0_48 = arith.constant 0 : index
    %c0_49 = arith.constant 0 : index
    %159 = vector.load %arg2[%c0_47, %c1, %c0_48, %c0_49] : memref<1x4x8x256xf32, #tpu.memory_space<vmem>>, vector<1x1x8x128xf32>
    %160 = vector.shape_cast %159 : vector<1x1x8x128xf32> to vector<1x8x128xf32>
    %161 = tpu.concatenate %158, %160 in 2 : vector<1x8x128xf32>, vector<1x8x128xf32> -> vector<1x8x256xf32>
    %c192_i32_50 = arith.constant 192 : i32
    %162 = tpu.dynamic_rotate %161 by %c192_i32_50 dim 2 : vector<1x8x256xf32>, i32 -> vector<1x8x256xf32>
    %c64_i32_51 = arith.constant 64 : i32
    %163 = tpu.dynamic_rotate %161 by %c64_i32_51 dim 2 : vector<1x8x256xf32>, i32 -> vector<1x8x256xf32>
    %164 = vector.shape_cast %26 : vector<1x1x256xi1> to vector<1x1x256xi1>
    %165 = vector.broadcast %164 : vector<1x1x256xi1> to vector<1x8x256xi1>
    %166 = arith.select %165, %163, %161 : vector<1x8x256xi1>, vector<1x8x256xf32>
    %167 = vector.shape_cast %21 : vector<1x1x256xi1> to vector<1x1x256xi1>
    %168 = vector.broadcast %167 : vector<1x1x256xi1> to vector<1x8x256xi1>
    %169 = arith.select %168, %162, %166 : vector<1x8x256xi1>, vector<1x8x256xf32>
    %c224_i32 = arith.constant 224 : i32
    %170 = tpu.dynamic_rotate %169 by %c224_i32 dim 2 : vector<1x8x256xf32>, i32 -> vector<1x8x256xf32>
    %c32_i32_52 = arith.constant 32 : i32
    %171 = tpu.dynamic_rotate %169 by %c32_i32_52 dim 2 : vector<1x8x256xf32>, i32 -> vector<1x8x256xf32>
    %172 = vector.shape_cast %52 : vector<1x1x256xi1> to vector<1x1x256xi1>
    %173 = vector.broadcast %172 : vector<1x1x256xi1> to vector<1x8x256xi1>
    %174 = arith.select %173, %171, %169 : vector<1x8x256xi1>, vector<1x8x256xf32>
    %175 = vector.shape_cast %47 : vector<1x1x256xi1> to vector<1x1x256xi1>
    %176 = vector.broadcast %175 : vector<1x1x256xi1> to vector<1x8x256xi1>
    %177 = arith.select %176, %170, %174 : vector<1x8x256xi1>, vector<1x8x256xf32>
    %c240_i32 = arith.constant 240 : i32
    %178 = tpu.dynamic_rotate %177 by %c240_i32 dim 2 : vector<1x8x256xf32>, i32 -> vector<1x8x256xf32>
    %c16_i32_53 = arith.constant 16 : i32
    %179 = tpu.dynamic_rotate %177 by %c16_i32_53 dim 2 : vector<1x8x256xf32>, i32 -> vector<1x8x256xf32>
    %180 = vector.shape_cast %78 : vector<1x1x256xi1> to vector<1x1x256xi1>
    %181 = vector.broadcast %180 : vector<1x1x256xi1> to vector<1x8x256xi1>
    %182 = arith.select %181, %179, %177 : vector<1x8x256xi1>, vector<1x8x256xf32>
    %183 = vector.shape_cast %73 : vector<1x1x256xi1> to vector<1x1x256xi1>
    %184 = vector.broadcast %183 : vector<1x1x256xi1> to vector<1x8x256xi1>
    %185 = arith.select %184, %178, %182 : vector<1x8x256xi1>, vector<1x8x256xf32>
    %c248_i32 = arith.constant 248 : i32
    %186 = tpu.dynamic_rotate %185 by %c248_i32 dim 2 : vector<1x8x256xf32>, i32 -> vector<1x8x256xf32>
    %c8_i32_54 = arith.constant 8 : i32
    %187 = tpu.dynamic_rotate %185 by %c8_i32_54 dim 2 : vector<1x8x256xf32>, i32 -> vector<1x8x256xf32>
    %188 = vector.shape_cast %104 : vector<1x1x256xi1> to vector<1x1x256xi1>
    %189 = vector.broadcast %188 : vector<1x1x256xi1> to vector<1x8x256xi1>
    %190 = arith.select %189, %187, %185 : vector<1x8x256xi1>, vector<1x8x256xf32>
    %191 = vector.shape_cast %99 : vector<1x1x256xi1> to vector<1x1x256xi1>
    %192 = vector.broadcast %191 : vector<1x1x256xi1> to vector<1x8x256xi1>
    %193 = arith.select %192, %186, %190 : vector<1x8x256xi1>, vector<1x8x256xf32>
    %c252_i32 = arith.constant 252 : i32
    %194 = tpu.dynamic_rotate %193 by %c252_i32 dim 2 : vector<1x8x256xf32>, i32 -> vector<1x8x256xf32>
    %c4_i32_55 = arith.constant 4 : i32
    %195 = tpu.dynamic_rotate %193 by %c4_i32_55 dim 2 : vector<1x8x256xf32>, i32 -> vector<1x8x256xf32>
    %196 = vector.shape_cast %130 : vector<1x1x256xi1> to vector<1x1x256xi1>
    %197 = vector.broadcast %196 : vector<1x1x256xi1> to vector<1x8x256xi1>
    %198 = arith.select %197, %195, %193 : vector<1x8x256xi1>, vector<1x8x256xf32>
    %199 = vector.shape_cast %125 : vector<1x1x256xi1> to vector<1x1x256xi1>
    %200 = vector.broadcast %199 : vector<1x1x256xi1> to vector<1x8x256xi1>
    %201 = arith.select %200, %194, %198 : vector<1x8x256xi1>, vector<1x8x256xf32>
    %c254_i32 = arith.constant 254 : i32
    %202 = tpu.dynamic_rotate %201 by %c254_i32 dim 2 : vector<1x8x256xf32>, i32 -> vector<1x8x256xf32>
    %c2_i32_56 = arith.constant 2 : i32
    %203 = tpu.dynamic_rotate %201 by %c2_i32_56 dim 2 : vector<1x8x256xf32>, i32 -> vector<1x8x256xf32>
    %204 = vector.shape_cast %156 : vector<1x1x256xi1> to vector<1x1x256xi1>
    %205 = vector.broadcast %204 : vector<1x1x256xi1> to vector<1x8x256xi1>
    %206 = arith.select %205, %203, %201 : vector<1x8x256xi1>, vector<1x8x256xf32>
    %207 = vector.shape_cast %151 : vector<1x1x256xi1> to vector<1x1x256xi1>
    %208 = vector.broadcast %207 : vector<1x1x256xi1> to vector<1x8x256xi1>
    %209 = arith.select %208, %202, %206 : vector<1x8x256xi1>, vector<1x8x256xf32>
    %c0_57 = arith.constant 0 : index
    %c0_58 = arith.constant 0 : index
    %c0_59 = arith.constant 0 : index
    %210 = vector.load %arg3[%c0_57, %c0_58, %c0_59] : memref<1x8x1024xf32, #tpu.memory_space<vmem>>, vector<1x8x256xf32>
    tpu.vector_store %arg3[%c0_57, %c0_58, %c0_59], %209 {strides = array<i32>} : memref<1x8x1024xf32, #tpu.memory_space<vmem>>, vector<1x8x256xf32>,
    %c0_60 = arith.constant 0 : index
    %c0_61 = arith.constant 0 : index
    %c0_62 = arith.constant 0 : index
    %c128 = arith.constant 128 : index
    %211 = vector.load %arg2[%c0_60, %c0_61, %c0_62, %c128] : memref<1x4x8x256xf32, #tpu.memory_space<vmem>>, vector<1x1x8x128xf32>
    %212 = vector.shape_cast %211 : vector<1x1x8x128xf32> to vector<1x8x128xf32>
    %c0_63 = arith.constant 0 : index
    %c1_64 = arith.constant 1 : index
    %c0_65 = arith.constant 0 : index
    %c128_66 = arith.constant 128 : index
    %213 = vector.load %arg2[%c0_63, %c1_64, %c0_65, %c128_66] : memref<1x4x8x256xf32, #tpu.memory_space<vmem>>, vector<1x1x8x128xf32>
    %214 = vector.shape_cast %213 : vector<1x1x8x128xf32> to vector<1x8x128xf32>
    %215 = tpu.concatenate %212, %214 in 2 : vector<1x8x128xf32>, vector<1x8x128xf32> -> vector<1x8x256xf32>
    %c192_i32_67 = arith.constant 192 : i32
    %216 = tpu.dynamic_rotate %215 by %c192_i32_67 dim 2 : vector<1x8x256xf32>, i32 -> vector<1x8x256xf32>
    %c64_i32_68 = arith.constant 64 : i32
    %217 = tpu.dynamic_rotate %215 by %c64_i32_68 dim 2 : vector<1x8x256xf32>, i32 -> vector<1x8x256xf32>
    %218 = vector.shape_cast %26 : vector<1x1x256xi1> to vector<1x1x256xi1>
    %219 = vector.broadcast %218 : vector<1x1x256xi1> to vector<1x8x256xi1>
    %220 = arith.select %219, %217, %215 : vector<1x8x256xi1>, vector<1x8x256xf32>
    %221 = vector.shape_cast %21 : vector<1x1x256xi1> to vector<1x1x256xi1>
    %222 = vector.broadcast %221 : vector<1x1x256xi1> to vector<1x8x256xi1>
    %223 = arith.select %222, %216, %220 : vector<1x8x256xi1>, vector<1x8x256xf32>
    %c224_i32_69 = arith.constant 224 : i32
    %224 = tpu.dynamic_rotate %223 by %c224_i32_69 dim 2 : vector<1x8x256xf32>, i32 -> vector<1x8x256xf32>
    %c32_i32_70 = arith.constant 32 : i32
    %225 = tpu.dynamic_rotate %223 by %c32_i32_70 dim 2 : vector<1x8x256xf32>, i32 -> vector<1x8x256xf32>
    %226 = vector.shape_cast %52 : vector<1x1x256xi1> to vector<1x1x256xi1>
    %227 = vector.broadcast %226 : vector<1x1x256xi1> to vector<1x8x256xi1>
    %228 = arith.select %227, %225, %223 : vector<1x8x256xi1>, vector<1x8x256xf32>
    %229 = vector.shape_cast %47 : vector<1x1x256xi1> to vector<1x1x256xi1>
    %230 = vector.broadcast %229 : vector<1x1x256xi1> to vector<1x8x256xi1>
    %231 = arith.select %230, %224, %228 : vector<1x8x256xi1>, vector<1x8x256xf32>
    %c240_i32_71 = arith.constant 240 : i32
    %232 = tpu.dynamic_rotate %231 by %c240_i32_71 dim 2 : vector<1x8x256xf32>, i32 -> vector<1x8x256xf32>
    %c16_i32_72 = arith.constant 16 : i32
    %233 = tpu.dynamic_rotate %231 by %c16_i32_72 dim 2 : vector<1x8x256xf32>, i32 -> vector<1x8x256xf32>
    %234 = vector.shape_cast %78 : vector<1x1x256xi1> to vector<1x1x256xi1>
    %235 = vector.broadcast %234 : vector<1x1x256xi1> to vector<1x8x256xi1>
    %236 = arith.select %235, %233, %231 : vector<1x8x256xi1>, vector<1x8x256xf32>
    %237 = vector.shape_cast %73 : vector<1x1x256xi1> to vector<1x1x256xi1>
    %238 = vector.broadcast %237 : vector<1x1x256xi1> to vector<1x8x256xi1>
    %239 = arith.select %238, %232, %236 : vector<1x8x256xi1>, vector<1x8x256xf32>
    %c248_i32_73 = arith.constant 248 : i32
    %240 = tpu.dynamic_rotate %239 by %c248_i32_73 dim 2 : vector<1x8x256xf32>, i32 -> vector<1x8x256xf32>
    %c8_i32_74 = arith.constant 8 : i32
    %241 = tpu.dynamic_rotate %239 by %c8_i32_74 dim 2 : vector<1x8x256xf32>, i32 -> vector<1x8x256xf32>
    %242 = vector.shape_cast %104 : vector<1x1x256xi1> to vector<1x1x256xi1>
    %243 = vector.broadcast %242 : vector<1x1x256xi1> to vector<1x8x256xi1>
    %244 = arith.select %243, %241, %239 : vector<1x8x256xi1>, vector<1x8x256xf32>
    %245 = vector.shape_cast %99 : vector<1x1x256xi1> to vector<1x1x256xi1>
    %246 = vector.broadcast %245 : vector<1x1x256xi1> to vector<1x8x256xi1>
    %247 = arith.select %246, %240, %244 : vector<1x8x256xi1>, vector<1x8x256xf32>
    %c252_i32_75 = arith.constant 252 : i32
    %248 = tpu.dynamic_rotate %247 by %c252_i32_75 dim 2 : vector<1x8x256xf32>, i32 -> vector<1x8x256xf32>
    %c4_i32_76 = arith.constant 4 : i32
    %249 = tpu.dynamic_rotate %247 by %c4_i32_76 dim 2 : vector<1x8x256xf32>, i32 -> vector<1x8x256xf32>
    %250 = vector.shape_cast %130 : vector<1x1x256xi1> to vector<1x1x256xi1>
    %251 = vector.broadcast %250 : vector<1x1x256xi1> to vector<1x8x256xi1>
    %252 = arith.select %251, %249, %247 : vector<1x8x256xi1>, vector<1x8x256xf32>
    %253 = vector.shape_cast %125 : vector<1x1x256xi1> to vector<1x1x256xi1>
    %254 = vector.broadcast %253 : vector<1x1x256xi1> to vector<1x8x256xi1>
    %255 = arith.select %254, %248, %252 : vector<1x8x256xi1>, vector<1x8x256xf32>
    %c254_i32_77 = arith.constant 254 : i32
    %256 = tpu.dynamic_rotate %255 by %c254_i32_77 dim 2 : vector<1x8x256xf32>, i32 -> vector<1x8x256xf32>
    %c2_i32_78 = arith.constant 2 : i32
    %257 = tpu.dynamic_rotate %255 by %c2_i32_78 dim 2 : vector<1x8x256xf32>, i32 -> vector<1x8x256xf32>
    %258 = vector.shape_cast %156 : vector<1x1x256xi1> to vector<1x1x256xi1>
    %259 = vector.broadcast %258 : vector<1x1x256xi1> to vector<1x8x256xi1>
    %260 = arith.select %259, %257, %255 : vector<1x8x256xi1>, vector<1x8x256xf32>
    %261 = vector.shape_cast %151 : vector<1x1x256xi1> to vector<1x1x256xi1>
    %262 = vector.broadcast %261 : vector<1x1x256xi1> to vector<1x8x256xi1>
    %263 = arith.select %262, %256, %260 : vector<1x8x256xi1>, vector<1x8x256xf32>
    %c0_79 = arith.constant 0 : index
    %c0_80 = arith.constant 0 : index
    %c256 = arith.constant 256 : index
    %264 = vector.load %arg3[%c0_79, %c0_80, %c256] : memref<1x8x1024xf32, #tpu.memory_space<vmem>>, vector<1x8x256xf32>
    tpu.vector_store %arg3[%c0_79, %c0_80, %c256], %263 {strides = array<i32>} : memref<1x8x1024xf32, #tpu.memory_space<vmem>>, vector<1x8x256xf32>,
    %c0_81 = arith.constant 0 : index
    %c2 = arith.constant 2 : index
    %c0_82 = arith.constant 0 : index
    %c0_83 = arith.constant 0 : index
    %265 = vector.load %arg2[%c0_81, %c2, %c0_82, %c0_83] : memref<1x4x8x256xf32, #tpu.memory_space<vmem>>, vector<1x1x8x128xf32>
    %266 = vector.shape_cast %265 : vector<1x1x8x128xf32> to vector<1x8x128xf32>
    %c0_84 = arith.constant 0 : index
    %c3 = arith.constant 3 : index
    %c0_85 = arith.constant 0 : index
    %c0_86 = arith.constant 0 : index
    %267 = vector.load %arg2[%c0_84, %c3, %c0_85, %c0_86] : memref<1x4x8x256xf32, #tpu.memory_space<vmem>>, vector<1x1x8x128xf32>
    %268 = vector.shape_cast %267 : vector<1x1x8x128xf32> to vector<1x8x128xf32>
    %269 = tpu.concatenate %266, %268 in 2 : vector<1x8x128xf32>, vector<1x8x128xf32> -> vector<1x8x256xf32>
    %c192_i32_87 = arith.constant 192 : i32
    %270 = tpu.dynamic_rotate %269 by %c192_i32_87 dim 2 : vector<1x8x256xf32>, i32 -> vector<1x8x256xf32>
    %c64_i32_88 = arith.constant 64 : i32
    %271 = tpu.dynamic_rotate %269 by %c64_i32_88 dim 2 : vector<1x8x256xf32>, i32 -> vector<1x8x256xf32>
    %272 = vector.shape_cast %26 : vector<1x1x256xi1> to vector<1x1x256xi1>
    %273 = vector.broadcast %272 : vector<1x1x256xi1> to vector<1x8x256xi1>
    %274 = arith.select %273, %271, %269 : vector<1x8x256xi1>, vector<1x8x256xf32>
    %275 = vector.shape_cast %21 : vector<1x1x256xi1> to vector<1x1x256xi1>
    %276 = vector.broadcast %275 : vector<1x1x256xi1> to vector<1x8x256xi1>
    %277 = arith.select %276, %270, %274 : vector<1x8x256xi1>, vector<1x8x256xf32>
    %c224_i32_89 = arith.constant 224 : i32
    %278 = tpu.dynamic_rotate %277 by %c224_i32_89 dim 2 : vector<1x8x256xf32>, i32 -> vector<1x8x256xf32>
    %c32_i32_90 = arith.constant 32 : i32
    %279 = tpu.dynamic_rotate %277 by %c32_i32_90 dim 2 : vector<1x8x256xf32>, i32 -> vector<1x8x256xf32>
    %280 = vector.shape_cast %52 : vector<1x1x256xi1> to vector<1x1x256xi1>
    %281 = vector.broadcast %280 : vector<1x1x256xi1> to vector<1x8x256xi1>
    %282 = arith.select %281, %279, %277 : vector<1x8x256xi1>, vector<1x8x256xf32>
    %283 = vector.shape_cast %47 : vector<1x1x256xi1> to vector<1x1x256xi1>
    %284 = vector.broadcast %283 : vector<1x1x256xi1> to vector<1x8x256xi1>
    %285 = arith.select %284, %278, %282 : vector<1x8x256xi1>, vector<1x8x256xf32>
    %c240_i32_91 = arith.constant 240 : i32
    %286 = tpu.dynamic_rotate %285 by %c240_i32_91 dim 2 : vector<1x8x256xf32>, i32 -> vector<1x8x256xf32>
    %c16_i32_92 = arith.constant 16 : i32
    %287 = tpu.dynamic_rotate %285 by %c16_i32_92 dim 2 : vector<1x8x256xf32>, i32 -> vector<1x8x256xf32>
    %288 = vector.shape_cast %78 : vector<1x1x256xi1> to vector<1x1x256xi1>
    %289 = vector.broadcast %288 : vector<1x1x256xi1> to vector<1x8x256xi1>
    %290 = arith.select %289, %287, %285 : vector<1x8x256xi1>, vector<1x8x256xf32>
    %291 = vector.shape_cast %73 : vector<1x1x256xi1> to vector<1x1x256xi1>
    %292 = vector.broadcast %291 : vector<1x1x256xi1> to vector<1x8x256xi1>
    %293 = arith.select %292, %286, %290 : vector<1x8x256xi1>, vector<1x8x256xf32>
    %c248_i32_93 = arith.constant 248 : i32
    %294 = tpu.dynamic_rotate %293 by %c248_i32_93 dim 2 : vector<1x8x256xf32>, i32 -> vector<1x8x256xf32>
    %c8_i32_94 = arith.constant 8 : i32
    %295 = tpu.dynamic_rotate %293 by %c8_i32_94 dim 2 : vector<1x8x256xf32>, i32 -> vector<1x8x256xf32>
    %296 = vector.shape_cast %104 : vector<1x1x256xi1> to vector<1x1x256xi1>
    %297 = vector.broadcast %296 : vector<1x1x256xi1> to vector<1x8x256xi1>
    %298 = arith.select %297, %295, %293 : vector<1x8x256xi1>, vector<1x8x256xf32>
    %299 = vector.shape_cast %99 : vector<1x1x256xi1> to vector<1x1x256xi1>
    %300 = vector.broadcast %299 : vector<1x1x256xi1> to vector<1x8x256xi1>
    %301 = arith.select %300, %294, %298 : vector<1x8x256xi1>, vector<1x8x256xf32>
    %c252_i32_95 = arith.constant 252 : i32
    %302 = tpu.dynamic_rotate %301 by %c252_i32_95 dim 2 : vector<1x8x256xf32>, i32 -> vector<1x8x256xf32>
    %c4_i32_96 = arith.constant 4 : i32
    %303 = tpu.dynamic_rotate %301 by %c4_i32_96 dim 2 : vector<1x8x256xf32>, i32 -> vector<1x8x256xf32>
    %304 = vector.shape_cast %130 : vector<1x1x256xi1> to vector<1x1x256xi1>
    %305 = vector.broadcast %304 : vector<1x1x256xi1> to vector<1x8x256xi1>
    %306 = arith.select %305, %303, %301 : vector<1x8x256xi1>, vector<1x8x256xf32>
    %307 = vector.shape_cast %125 : vector<1x1x256xi1> to vector<1x1x256xi1>
    %308 = vector.broadcast %307 : vector<1x1x256xi1> to vector<1x8x256xi1>
    %309 = arith.select %308, %302, %306 : vector<1x8x256xi1>, vector<1x8x256xf32>
    %c254_i32_97 = arith.constant 254 : i32
    %310 = tpu.dynamic_rotate %309 by %c254_i32_97 dim 2 : vector<1x8x256xf32>, i32 -> vector<1x8x256xf32>
    %c2_i32_98 = arith.constant 2 : i32
    %311 = tpu.dynamic_rotate %309 by %c2_i32_98 dim 2 : vector<1x8x256xf32>, i32 -> vector<1x8x256xf32>
    %312 = vector.shape_cast %156 : vector<1x1x256xi1> to vector<1x1x256xi1>
    %313 = vector.broadcast %312 : vector<1x1x256xi1> to vector<1x8x256xi1>
    %314 = arith.select %313, %311, %309 : vector<1x8x256xi1>, vector<1x8x256xf32>
    %315 = vector.shape_cast %151 : vector<1x1x256xi1> to vector<1x1x256xi1>
    %316 = vector.broadcast %315 : vector<1x1x256xi1> to vector<1x8x256xi1>
    %317 = arith.select %316, %310, %314 : vector<1x8x256xi1>, vector<1x8x256xf32>
    %c0_99 = arith.constant 0 : index
    %c0_100 = arith.constant 0 : index
    %c512 = arith.constant 512 : index
    %318 = vector.load %arg3[%c0_99, %c0_100, %c512] : memref<1x8x1024xf32, #tpu.memory_space<vmem>>, vector<1x8x256xf32>
    tpu.vector_store %arg3[%c0_99, %c0_100, %c512], %317 {strides = array<i32>} : memref<1x8x1024xf32, #tpu.memory_space<vmem>>, vector<1x8x256xf32>,
    %c0_101 = arith.constant 0 : index
    %c2_102 = arith.constant 2 : index
    %c0_103 = arith.constant 0 : index
    %c128_104 = arith.constant 128 : index
    %319 = vector.load %arg2[%c0_101, %c2_102, %c0_103, %c128_104] : memref<1x4x8x256xf32, #tpu.memory_space<vmem>>, vector<1x1x8x128xf32>
    %320 = vector.shape_cast %319 : vector<1x1x8x128xf32> to vector<1x8x128xf32>
    %c0_105 = arith.constant 0 : index
    %c3_106 = arith.constant 3 : index
    %c0_107 = arith.constant 0 : index
    %c128_108 = arith.constant 128 : index
    %321 = vector.load %arg2[%c0_105, %c3_106, %c0_107, %c128_108] : memref<1x4x8x256xf32, #tpu.memory_space<vmem>>, vector<1x1x8x128xf32>
    %322 = vector.shape_cast %321 : vector<1x1x8x128xf32> to vector<1x8x128xf32>
    %323 = tpu.concatenate %320, %322 in 2 : vector<1x8x128xf32>, vector<1x8x128xf32> -> vector<1x8x256xf32>
    %c192_i32_109 = arith.constant 192 : i32
    %324 = tpu.dynamic_rotate %323 by %c192_i32_109 dim 2 : vector<1x8x256xf32>, i32 -> vector<1x8x256xf32>
    %c64_i32_110 = arith.constant 64 : i32
    %325 = tpu.dynamic_rotate %323 by %c64_i32_110 dim 2 : vector<1x8x256xf32>, i32 -> vector<1x8x256xf32>
    %326 = vector.shape_cast %26 : vector<1x1x256xi1> to vector<1x1x256xi1>
    %327 = vector.broadcast %326 : vector<1x1x256xi1> to vector<1x8x256xi1>
    %328 = arith.select %327, %325, %323 : vector<1x8x256xi1>, vector<1x8x256xf32>
    %329 = vector.shape_cast %21 : vector<1x1x256xi1> to vector<1x1x256xi1>
    %330 = vector.broadcast %329 : vector<1x1x256xi1> to vector<1x8x256xi1>
    %331 = arith.select %330, %324, %328 : vector<1x8x256xi1>, vector<1x8x256xf32>
    %c224_i32_111 = arith.constant 224 : i32
    %332 = tpu.dynamic_rotate %331 by %c224_i32_111 dim 2 : vector<1x8x256xf32>, i32 -> vector<1x8x256xf32>
    %c32_i32_112 = arith.constant 32 : i32
    %333 = tpu.dynamic_rotate %331 by %c32_i32_112 dim 2 : vector<1x8x256xf32>, i32 -> vector<1x8x256xf32>
    %334 = vector.shape_cast %52 : vector<1x1x256xi1> to vector<1x1x256xi1>
    %335 = vector.broadcast %334 : vector<1x1x256xi1> to vector<1x8x256xi1>
    %336 = arith.select %335, %333, %331 : vector<1x8x256xi1>, vector<1x8x256xf32>
    %337 = vector.shape_cast %47 : vector<1x1x256xi1> to vector<1x1x256xi1>
    %338 = vector.broadcast %337 : vector<1x1x256xi1> to vector<1x8x256xi1>
    %339 = arith.select %338, %332, %336 : vector<1x8x256xi1>, vector<1x8x256xf32>
    %c240_i32_113 = arith.constant 240 : i32
    %340 = tpu.dynamic_rotate %339 by %c240_i32_113 dim 2 : vector<1x8x256xf32>, i32 -> vector<1x8x256xf32>
    %c16_i32_114 = arith.constant 16 : i32
    %341 = tpu.dynamic_rotate %339 by %c16_i32_114 dim 2 : vector<1x8x256xf32>, i32 -> vector<1x8x256xf32>
    %342 = vector.shape_cast %78 : vector<1x1x256xi1> to vector<1x1x256xi1>
    %343 = vector.broadcast %342 : vector<1x1x256xi1> to vector<1x8x256xi1>
    %344 = arith.select %343, %341, %339 : vector<1x8x256xi1>, vector<1x8x256xf32>
    %345 = vector.shape_cast %73 : vector<1x1x256xi1> to vector<1x1x256xi1>
    %346 = vector.broadcast %345 : vector<1x1x256xi1> to vector<1x8x256xi1>
    %347 = arith.select %346, %340, %344 : vector<1x8x256xi1>, vector<1x8x256xf32>
    %c248_i32_115 = arith.constant 248 : i32
    %348 = tpu.dynamic_rotate %347 by %c248_i32_115 dim 2 : vector<1x8x256xf32>, i32 -> vector<1x8x256xf32>
    %c8_i32_116 = arith.constant 8 : i32
    %349 = tpu.dynamic_rotate %347 by %c8_i32_116 dim 2 : vector<1x8x256xf32>, i32 -> vector<1x8x256xf32>
    %350 = vector.shape_cast %104 : vector<1x1x256xi1> to vector<1x1x256xi1>
    %351 = vector.broadcast %350 : vector<1x1x256xi1> to vector<1x8x256xi1>
    %352 = arith.select %351, %349, %347 : vector<1x8x256xi1>, vector<1x8x256xf32>
    %353 = vector.shape_cast %99 : vector<1x1x256xi1> to vector<1x1x256xi1>
    %354 = vector.broadcast %353 : vector<1x1x256xi1> to vector<1x8x256xi1>
    %355 = arith.select %354, %348, %352 : vector<1x8x256xi1>, vector<1x8x256xf32>
    %c252_i32_117 = arith.constant 252 : i32
    %356 = tpu.dynamic_rotate %355 by %c252_i32_117 dim 2 : vector<1x8x256xf32>, i32 -> vector<1x8x256xf32>
    %c4_i32_118 = arith.constant 4 : i32
    %357 = tpu.dynamic_rotate %355 by %c4_i32_118 dim 2 : vector<1x8x256xf32>, i32 -> vector<1x8x256xf32>
    %358 = vector.shape_cast %130 : vector<1x1x256xi1> to vector<1x1x256xi1>
    %359 = vector.broadcast %358 : vector<1x1x256xi1> to vector<1x8x256xi1>
    %360 = arith.select %359, %357, %355 : vector<1x8x256xi1>, vector<1x8x256xf32>
    %361 = vector.shape_cast %125 : vector<1x1x256xi1> to vector<1x1x256xi1>
    %362 = vector.broadcast %361 : vector<1x1x256xi1> to vector<1x8x256xi1>
    %363 = arith.select %362, %356, %360 : vector<1x8x256xi1>, vector<1x8x256xf32>
    %c254_i32_119 = arith.constant 254 : i32
    %364 = tpu.dynamic_rotate %363 by %c254_i32_119 dim 2 : vector<1x8x256xf32>, i32 -> vector<1x8x256xf32>
    %c2_i32_120 = arith.constant 2 : i32
    %365 = tpu.dynamic_rotate %363 by %c2_i32_120 dim 2 : vector<1x8x256xf32>, i32 -> vector<1x8x256xf32>
    %366 = vector.shape_cast %156 : vector<1x1x256xi1> to vector<1x1x256xi1>
    %367 = vector.broadcast %366 : vector<1x1x256xi1> to vector<1x8x256xi1>
    %368 = arith.select %367, %365, %363 : vector<1x8x256xi1>, vector<1x8x256xf32>
    %369 = vector.shape_cast %151 : vector<1x1x256xi1> to vector<1x1x256xi1>
    %370 = vector.broadcast %369 : vector<1x1x256xi1> to vector<1x8x256xi1>
    %371 = arith.select %370, %364, %368 : vector<1x8x256xi1>, vector<1x8x256xf32>
    %c0_121 = arith.constant 0 : index
    %c0_122 = arith.constant 0 : index
    %c768 = arith.constant 768 : index
    %372 = vector.load %arg3[%c0_121, %c0_122, %c768] : memref<1x8x1024xf32, #tpu.memory_space<vmem>>, vector<1x8x256xf32>
    tpu.vector_store %arg3[%c0_121, %c0_122, %c768], %371 {strides = array<i32>} : memref<1x8x1024xf32, #tpu.memory_space<vmem>>, vector<1x8x256xf32>,
    return
  }
  func.func @transform_0(%arg0: i32, %arg1: i32) -> (i32, i32, i32, i32) {
    %c0_i32 = arith.constant 0 : i32
    %c0_i32_0 = arith.constant 0 : i32
    %c0_i32_1 = arith.constant 0 : i32
    return %arg0, %c0_i32, %arg1, %c0_i32_0 : i32, i32, i32, i32
  }
  func.func @transform_1(%arg0: i32, %arg1: i32) -> (i32, i32, i32) {
    %c0_i32 = arith.constant 0 : i32
    %c0_i32_0 = arith.constant 0 : i32
    return %arg0, %arg1, %c0_i32 : i32, i32, i32
  }
}

</mosaic_0001>

<bundles_post_ra>
// kernel: decoder_forward.1
= control target key start
LH: loop header
LB: loop body
LE: loop exit
PB: predicated region body
PF: predicated region fallthrough
CT: control target
= control target key end

     0   :  { %s1001_s6 = smov 0   ;;  %s1003_s7 = smov 0   ;;  %s1748_s0 = inlined_call_operand.vmem [shape: f32[4,4,8,256], index: 0, kind: input, shape index: {}]   ;;  %s1749_s1 = inlined_call_operand.vmem [shape: f32[4,8,1024], index: 1, kind: output, shape index: {}]  }
   0x1   :  { %s1005_s8 = smov 0  }
   0x2 LB: > { %s23_s9 = sadd.s32 1, %s974_s7  ;;  %p906_p0 = scmp.ge.s32.totalorder %s978_s8, 1  ;;  %s978_s8 = sphi %s1005_s8, %s11_s8   ;;  %s974_s7 = sphi %s1003_s7, %s1795_s7   ;;  %s970_s6 = sphi %s1001_s6, %s1794_s6  }
   0x3   : > { %p25_p1 = scmp.ge.s32.totalorder %s23_s9, 4  ;;  %p107_p2 = scmp.lt.s32.totalorder %s978_s8, 5 }
   0x5   : > { %s1797_s9 = smov (%p25_p1, %s23_s9), 0  ;;  %p108_p3 = pnand %p906_p0, %p107_p2 }
   0x6   : > { %p135_p4 = scmp.lt.s32.totalorder (!%p108_p3), %s970_s6, 3  ;;  %s980_s14 = smov (!%p108_p3), 64   ;;  %v153_v8 = vlaneseq (!%p108_p3) }
   0x7   : > { %111 = sbr.rel (%p108_p3) target bundleno = 817 (0x331), region = 24  ;;  %s981_s15 = smov (!%p108_p3), 32  }
   0x8   : > { %v1027_v9 = vand.u32 (!%p108_p3), 127, %v153_v8  ;;  %s982_s16 = smov (!%p108_p3), 96   ;;  %s983_s17 = smov (!%p108_p3), 16  }
   0x9   : > { %s984_s18 = smov (!%p108_p3), 112   ;;  %s985_s19 = smov (!%p108_p3), 8  }
   0xa   : > { %v1030_v10 = vadd.s32 (!%p108_p3), 128, %v1027_v9  ;;  %v160_v11 = vand.u32 (!%p108_p3), 255, %v1027_v9  ;;  %vm218_vm0 = vcmp.lt.s32.totalorder (!%p108_p3), %v1027_v9, 64  ;;  %vm224_vm5 = vcmp.lt.s32.totalorder (!%p108_p3), %v1027_v9, 96  ;;  %s986_s20 = smov (!%p108_p3), 120   ;;  %s987_s21 = smov (!%p108_p3), 4  }
   0xb   : > { %vm222_vm6 = vcmp.ge.s32.totalorder (!%p108_p3), %v1027_v9, 64  ;;  %vm405_vm7 = vcmp.lt.s32.totalorder (!%p108_p3), %v1027_v9, 32  ;;  %vm216_vm11 = vcmp.ge.s32.totalorder (!%p108_p3), %v1027_v9, 32  ;;  %s988_s22 = smov (!%p108_p3), 124   ;;  %s989_s23 = smov (!%p108_p3), 2  }
   0xc   : > { %v167_v12 = vand.u32 (!%p108_p3), 255, %v1030_v10  ;;  %vm1035_vm1 = vcmp.ge.s32.totalorder (!%p108_p3), %v160_v11, 64  ;;  %v203_v39 = vand.u32 (!%p108_p3), 127, %v1030_v10  ;;  %vm1110_vm12 = vmand (!%p108_p3), %vm222_vm6, %vm224_vm5  ;;  %s990_s24 = smov (!%p108_p3), 126  }
   0xd   : > { %vm1124_vm14 = vmand (!%p108_p3), %vm216_vm11, %vm218_vm0 }
   0xe   : > { %s1799_s6 = smov (!%p135_p4, %s970_s6), 3  ;;  %vm1039_vm2 = vcmp.lt.s32.totalorder %v167_v12, 192  ;;  %vm223_vm3 = vcmp.ge.s32.totalorder %v203_v39, 64  ;;  %vm225_vm4 = vcmp.lt.s32.totalorder %v203_v39, 96  ;;  %vm217_vm8 = vcmp.ge.s32.totalorder %v203_v39, 32 }
   0xf   : > { %s919_s10 = sshll.u32 %s1799_s6, 6  ;;  %vm219_vm9 = vcmp.lt.s32.totalorder %v203_v39, 64  ;;  %vm1103_vm10 = vmand %vm223_vm3, %vm225_vm4  ;;  %vm431_vm3 = vcmp.lt.s32.totalorder %v1027_v9, 16 }
  0x10   : > { %s143_s13 = scalar_lea.vmem %s1748_s0, %s919_s10  ;;  %vm1118_vm13 = vmand %vm217_vm8, %vm219_vm9  ;;  %s1661_s27 = scalar_lea.vmem %s1749_s1, %s919_s10 }
  0x11   : > { %v526_v0 = vld [vmem:[%s143_s13 + $0x8] sm:$0xff]  ;;  %v372_v1 = vld [vmem:[%s143_s13] sm:$0xff]  ;;  %v912_v2 = vld [vmem:[%s143_s13 + $0x18] sm:$0xff] }
  0x12   : > { %528 = vrot.lane.b32.xlu1 %v526_v0, %s980_s14  ;;  %375 = vrot.lane.b32.xlu0 %v372_v1, %s980_s14  ;;  %v911_v3 = vld [vmem:[%s143_s13 + $0x10] sm:$0xff]  ;;  %v913_v5 = vld [vmem:[%s143_s13 + $0x20] sm:$0xff] }
  0x13   : > { %v914_v4 = vld [vmem:[%s143_s13 + $0x30] sm:$0xff]  ;;  %v916_v6 = vld [vmem:[%s143_s13 + $0x38] sm:$0xff]  ;;  %v915_v7 = vld [vmem:[%s143_s13 + $0x28] sm:$0xff] }
  0x16   : > { %530 = vrot.lane.b32.xlu1 %v912_v2, %s980_s14  ;;  %377 = vrot.lane.b32.xlu0 %v911_v3, %s980_s14 }
  0x1a   : > { %626 = vrot.lane.b32.xlu1 %v914_v4, %s980_s14  ;;  %624 = vrot.lane.b32.xlu0 %v913_v5, %s980_s14 }
  0x1e   : > { %720 = vrot.lane.b32.xlu1 %v916_v6, %s980_s14  ;;  %718 = vrot.lane.b32.xlu0 %v915_v7, %s980_s14 }
  0x84   : > { %v529_v13 = vpop.permute.xlu1 %528  ;;  %v376_v14 = vpop.permute.xlu0 %375 }
  0x88   : > { %v531_v17 = vpop.permute.xlu1 %530  ;;  %v378_v18 = vpop.permute.xlu0 %377 }
  0x89   : > { %v380_v19 = vsel %vm218_vm0, %v376_v14, %v378_v18  ;;  %v532_v22 = vsel %vm218_vm0, %v529_v13, %v531_v17 }
  0x8a   : > { %v1047_v20 = vsel %vm1035_vm1, %v380_v19, %v372_v1  ;;  %v1051_v21 = vsel %vm1039_vm2, %v380_v19, %v911_v3  ;;  %v1061_v26 = vsel %vm1035_vm1, %v532_v22, %v526_v0  ;;  %v1065_v27 = vsel %vm1039_vm2, %v532_v22, %v912_v2 }
  0x8b   : > { %401 = vrot.lane.b32.xlu0 %v1047_v20, %s981_s15  ;;  %403 = vrot.lane.b32.xlu1 %v1051_v21, %s981_s15 }
  0x8c   : > { %v627_v23 = vpop.permute.xlu1 %626  ;;  %v625_v24 = vpop.permute.xlu0 %624 }
  0x8d   : > { %v628_v25 = vsel %vm218_vm0, %v625_v24, %v627_v23 }
  0x8e   : > { %v1071_v28 = vsel %vm1035_vm1, %v628_v25, %v913_v5  ;;  %v1075_v29 = vsel %vm1039_vm2, %v628_v25, %v914_v4 }
  0x8f   : > { %544 = vrot.lane.b32.xlu0 %v1061_v26, %s981_s15  ;;  %546 = vrot.lane.b32.xlu1 %v1065_v27, %s981_s15 }
  0x90   : > { %v721_v30 = vpop.permute.xlu1 %720  ;;  %v719_v31 = vpop.permute.xlu0 %718 }
  0x91   : > { %v722_v32 = vsel %vm218_vm0, %v719_v31, %v721_v30  ;;  %v239_v30 = vand.u32 63, %v1030_v10  ;;  %v232_v31 = vand.u32 63, %v1027_v9 }
  0x92   : > { %v1083_v33 = vsel %vm1035_vm1, %v722_v32, %v915_v7  ;;  %v1087_v34 = vsel %vm1039_vm2, %v722_v32, %v916_v6 }
  0x93   : > { %640 = vrot.lane.b32.xlu0 %v1071_v28, %s981_s15  ;;  %642 = vrot.lane.b32.xlu1 %v1075_v29, %s981_s15  ;;  %vm259_vm15 = vcmp.ge.s32.totalorder %v239_v30, 32  ;;  %vm261_vm0 = vcmp.lt.s32.totalorder %v239_v30, 48  ;;  %vm258_vm1 = vcmp.ge.s32.totalorder %v232_v31, 32  ;;  %vm260_vm2 = vcmp.lt.s32.totalorder %v232_v31, 48 }
  0x94   : > { %vm253_vm4 = vcmp.ge.s32.totalorder %v239_v30, 16  ;;  %vm1239_vm6 = vmand %vm259_vm15, %vm261_vm0  ;;  %vm254_vm8 = vcmp.lt.s32.totalorder %v232_v31, 32 }
  0x95   : > { %vm1243_vm9 = vmand %vm258_vm1, %vm260_vm2  ;;  %vm457_vm1 = vcmp.lt.s32.totalorder %v1027_v9, 8 }
  0x97   : > { %734 = vrot.lane.b32.xlu0 %v1083_v33, %s981_s15  ;;  %736 = vrot.lane.b32.xlu1 %v1087_v34, %s981_s15 }
  0x9b   : > { %394 = vrot.lane.b32.xlu0 %v1047_v20, %s982_s16  ;;  %396 = vrot.lane.b32.xlu1 %v1051_v21, %s982_s16 }
  0x9f   : > { %538 = vrot.lane.b32.xlu0 %v1061_v26, %s982_s16  ;;  %540 = vrot.lane.b32.xlu1 %v1065_v27, %s982_s16 }
  0xa3   : > { %634 = vrot.lane.b32.xlu0 %v1071_v28, %s982_s16  ;;  %636 = vrot.lane.b32.xlu1 %v1075_v29, %s982_s16 }
  0xa7   : > { %728 = vrot.lane.b32.xlu0 %v1083_v33, %s982_s16  ;;  %730 = vrot.lane.b32.xlu1 %v1087_v34, %s982_s16 }
  0xfd   : > { %v404_v35 = vpop.permute.xlu1 %403  ;;  %v402_v36 = vpop.permute.xlu0 %401 }
  0xfe   : > { %v406_v46 = vsel %vm405_vm7, %v402_v36, %v404_v35  ;;  %v407_v47 = vsel %vm405_vm7, %v404_v35, %v402_v36 }
  0xff   : > { %v413_v54 = vsel %vm1103_vm10, %v406_v46, %v1051_v21  ;;  %v412_v55 = vsel %vm1110_vm12, %v407_v47, %v1047_v20 }
 0x101   : > { %v547_v37 = vpop.permute.xlu1 %546  ;;  %v545_v38 = vpop.permute.xlu0 %544 }
 0x102   : > { %v548_v56 = vsel %vm405_vm7, %v545_v38, %v547_v37  ;;  %v549_v57 = vsel %vm405_vm7, %v547_v37, %v545_v38 }
 0x103   : > { %v551_v0 = vsel %vm1103_vm10, %v548_v56, %v1065_v27  ;;  %v550_v1 = vsel %vm1110_vm12, %v549_v57, %v1061_v26 }
 0x105   : > { %v643_v40 = vpop.permute.xlu1 %642  ;;  %v641_v41 = vpop.permute.xlu0 %640 }
 0x106   : > { %v644_v2 = vsel %vm405_vm7, %v641_v41, %v643_v40  ;;  %v645_v3 = vsel %vm405_vm7, %v643_v40, %v641_v41 }
 0x107   : > { %v647_v12 = vsel %vm1103_vm10, %v644_v2, %v1075_v29  ;;  %v646_v13 = vsel %vm1110_vm12, %v645_v3, %v1071_v28 }
 0x109   : > { %v737_v42 = vpop.permute.xlu1 %736  ;;  %v735_v43 = vpop.permute.xlu0 %734 }
 0x10a   : > { %v738_v14 = vsel %vm405_vm7, %v735_v43, %v737_v42  ;;  %v739_v15 = vsel %vm405_vm7, %v737_v42, %v735_v43  ;;  %vm252_vm7 = vcmp.ge.s32.totalorder %v232_v31, 16 }
 0x10b   : > { %v741_v22 = vsel %vm1103_vm10, %v738_v14, %v1087_v34  ;;  %v740_v23 = vsel %vm1110_vm12, %v739_v15, %v1083_v33  ;;  %vm424_vm10 = vcmp.lt.s32.totalorder %v1027_v9, 112  ;;  %vm1256_vm12 = vmand %vm252_vm7, %vm254_vm8  ;;  %vm450_vm8 = vcmp.lt.s32.totalorder %v1027_v9, 120 }
 0x10d   : > { %v397_v50 = vpop.permute.xlu1 %396  ;;  %v395_v51 = vpop.permute.xlu0 %394 }
 0x10e   : > { %v399_v52 = vsel %vm224_vm5, %v395_v51, %v397_v50  ;;  %v400_v53 = vsel %vm224_vm5, %v397_v50, %v395_v51 }
 0x10f   : > { %v1144_v58 = vsel %vm1118_vm13, %v400_v53, %v413_v54  ;;  %v1148_v59 = vsel %vm1124_vm14, %v399_v52, %v412_v55 }
 0x110   : > { %429 = vrot.lane.b32.xlu1 %v1144_v58, %s983_s17  ;;  %427 = vrot.lane.b32.xlu0 %v1148_v59, %s983_s17 }
 0x111   : > { %v541_v60 = vpop.permute.xlu1 %540  ;;  %v539_v61 = vpop.permute.xlu0 %538 }
 0x112   : > { %v542_v62 = vsel %vm224_vm5, %v539_v61, %v541_v60  ;;  %v543_v63 = vsel %vm224_vm5, %v541_v60, %v539_v61 }
 0x113   : > { %v1170_v4 = vsel %vm1118_vm13, %v543_v63, %v551_v0  ;;  %v1174_v5 = vsel %vm1124_vm14, %v542_v62, %v550_v1 }
 0x114   : > { %562 = vrot.lane.b32.xlu1 %v1170_v4, %s983_s17  ;;  %560 = vrot.lane.b32.xlu0 %v1174_v5, %s983_s17 }
 0x115   : > { %v637_v6 = vpop.permute.xlu1 %636  ;;  %v635_v7 = vpop.permute.xlu0 %634 }
 0x116   : > { %v638_v8 = vsel %vm224_vm5, %v635_v7, %v637_v6  ;;  %v639_v11 = vsel %vm224_vm5, %v637_v6, %v635_v7 }
 0x117   : > { %v1196_v16 = vsel %vm1118_vm13, %v639_v11, %v647_v12  ;;  %v1200_v17 = vsel %vm1124_vm14, %v638_v8, %v646_v13 }
 0x118   : > { %658 = vrot.lane.b32.xlu1 %v1196_v16, %s983_s17  ;;  %656 = vrot.lane.b32.xlu0 %v1200_v17, %s983_s17 }
 0x119   : > { %v731_v18 = vpop.permute.xlu1 %730  ;;  %v729_v19 = vpop.permute.xlu0 %728 }
 0x11a   : > { %v732_v20 = vsel %vm224_vm5, %v729_v19, %v731_v18  ;;  %v733_v21 = vsel %vm224_vm5, %v731_v18, %v729_v19  ;;  %vm255_vm5 = vcmp.lt.s32.totalorder %v239_v30, 32 }
 0x11b   : > { %v1218_v24 = vsel %vm1118_vm13, %v733_v21, %v741_v22  ;;  %v1222_v25 = vsel %vm1124_vm14, %v732_v20, %v740_v23  ;;  %vm1252_vm11 = vmand %vm253_vm4, %vm255_vm5  ;;  %v275_v22 = vand.u32 31, %v1030_v10  ;;  %v268_v23 = vand.u32 31, %v1027_v9 }
 0x11c   : > { %752 = vrot.lane.b32.xlu1 %v1218_v24, %s983_s17  ;;  %750 = vrot.lane.b32.xlu0 %v1222_v25, %s983_s17 }
 0x11d   : > { %vm295_vm13 = vcmp.ge.s32.totalorder %v275_v22, 16  ;;  %vm297_vm14 = vcmp.lt.s32.totalorder %v275_v22, 24  ;;  %vm294_vm15 = vcmp.ge.s32.totalorder %v268_v23, 16  ;;  %vm296_vm0 = vcmp.lt.s32.totalorder %v268_v23, 24 }
 0x11e   : > { %vm289_vm2 = vcmp.ge.s32.totalorder %v275_v22, 8  ;;  %vm1371_vm4 = vmand %vm295_vm13, %vm297_vm14  ;;  %vm288_vm5 = vcmp.ge.s32.totalorder %v268_v23, 8 }
 0x11f   : > { %vm1375_vm7 = vmand %vm294_vm15, %vm296_vm0  ;;  %vm483_vm15 = vcmp.lt.s32.totalorder %v1027_v9, 4 }
 0x120   : > { %422 = vrot.lane.b32.xlu1 %v1144_v58, %s984_s18  ;;  %420 = vrot.lane.b32.xlu0 %v1148_v59, %s984_s18 }
 0x124   : > { %556 = vrot.lane.b32.xlu1 %v1170_v4, %s984_s18  ;;  %554 = vrot.lane.b32.xlu0 %v1174_v5, %s984_s18 }
 0x128   : > { %652 = vrot.lane.b32.xlu1 %v1196_v16, %s984_s18  ;;  %650 = vrot.lane.b32.xlu0 %v1200_v17, %s984_s18 }
 0x12c   : > { %746 = vrot.lane.b32.xlu1 %v1218_v24, %s984_s18  ;;  %744 = vrot.lane.b32.xlu0 %v1222_v25, %s984_s18 }
 0x182   : > { %v430_v26 = vpop.permute.xlu1 %429  ;;  %v428_v27 = vpop.permute.xlu0 %427 }
 0x183   : > { %v432_v38 = vsel %vm431_vm3, %v428_v27, %v430_v26  ;;  %v433_v39 = vsel %vm431_vm3, %v430_v26, %v428_v27 }
 0x184   : > { %v439_v46 = vsel %vm1239_vm6, %v432_v38, %v1144_v58  ;;  %v438_v47 = vsel %vm1243_vm9, %v433_v39, %v1148_v59 }
 0x186   : > { %v563_v28 = vpop.permute.xlu1 %562  ;;  %v561_v29 = vpop.permute.xlu0 %560 }
 0x187   : > { %v564_v48 = vsel %vm431_vm3, %v561_v29, %v563_v28  ;;  %v565_v49 = vsel %vm431_vm3, %v563_v28, %v561_v29 }
 0x188   : > { %v567_v56 = vsel %vm1239_vm6, %v564_v48, %v1170_v4  ;;  %v566_v57 = vsel %vm1243_vm9, %v565_v49, %v1174_v5 }
 0x18a   : > { %v659_v32 = vpop.permute.xlu1 %658  ;;  %v657_v33 = vpop.permute.xlu0 %656 }
 0x18b   : > { %v660_v58 = vsel %vm431_vm3, %v657_v33, %v659_v32  ;;  %v661_v59 = vsel %vm431_vm3, %v659_v32, %v657_v33 }
 0x18c   : > { %v663_v2 = vsel %vm1239_vm6, %v660_v58, %v1196_v16  ;;  %v662_v3 = vsel %vm1243_vm9, %v661_v59, %v1200_v17 }
 0x18e   : > { %v753_v34 = vpop.permute.xlu1 %752  ;;  %v751_v35 = vpop.permute.xlu0 %750 }
 0x18f   : > { %v754_v4 = vsel %vm431_vm3, %v751_v35, %v753_v34  ;;  %v755_v5 = vsel %vm431_vm3, %v753_v34, %v751_v35  ;;  %vm291_vm3 = vcmp.lt.s32.totalorder %v275_v22, 16 }
 0x190   : > { %v757_v14 = vsel %vm1239_vm6, %v754_v4, %v1218_v24  ;;  %v756_v15 = vsel %vm1243_vm9, %v755_v5, %v1222_v25  ;;  %vm290_vm6 = vcmp.lt.s32.totalorder %v268_v23, 16  ;;  %vm1384_vm9 = vmand %vm289_vm2, %vm291_vm3 }
 0x192   : > { %v423_v42 = vpop.permute.xlu1 %422  ;;  %v421_v43 = vpop.permute.xlu0 %420 }
 0x193   : > { %v425_v44 = vsel %vm424_vm10, %v421_v43, %v423_v42  ;;  %v426_v45 = vsel %vm424_vm10, %v423_v42, %v421_v43 }
 0x194   : > { %v1276_v50 = vsel %vm1252_vm11, %v426_v45, %v439_v46  ;;  %v1280_v51 = vsel %vm1256_vm12, %v425_v44, %v438_v47 }
 0x195   : > { %455 = vrot.lane.b32.xlu1 %v1276_v50, %s985_s19  ;;  %453 = vrot.lane.b32.xlu0 %v1280_v51, %s985_s19 }
 0x196   : > { %v557_v52 = vpop.permute.xlu1 %556  ;;  %v555_v53 = vpop.permute.xlu0 %554 }
 0x197   : > { %v558_v54 = vsel %vm424_vm10, %v555_v53, %v557_v52  ;;  %v559_v55 = vsel %vm424_vm10, %v557_v52, %v555_v53 }
 0x198   : > { %v1302_v60 = vsel %vm1252_vm11, %v559_v55, %v567_v56  ;;  %v1306_v61 = vsel %vm1256_vm12, %v558_v54, %v566_v57 }
 0x199   : > { %578 = vrot.lane.b32.xlu1 %v1302_v60, %s985_s19  ;;  %576 = vrot.lane.b32.xlu0 %v1306_v61, %s985_s19 }
 0x19a   : > { %v653_v62 = vpop.permute.xlu1 %652  ;;  %v651_v63 = vpop.permute.xlu0 %650 }
 0x19b   : > { %v654_v0 = vsel %vm424_vm10, %v651_v63, %v653_v62  ;;  %v655_v1 = vsel %vm424_vm10, %v653_v62, %v651_v63 }
 0x19c   : > { %v1328_v6 = vsel %vm1252_vm11, %v655_v1, %v663_v2  ;;  %v1332_v7 = vsel %vm1256_vm12, %v654_v0, %v662_v3 }
 0x19d   : > { %674 = vrot.lane.b32.xlu1 %v1328_v6, %s985_s19  ;;  %672 = vrot.lane.b32.xlu0 %v1332_v7, %s985_s19 }
 0x19e   : > { %v747_v8 = vpop.permute.xlu1 %746  ;;  %v745_v11 = vpop.permute.xlu0 %744 }
 0x19f   : > { %v748_v12 = vsel %vm424_vm10, %v745_v11, %v747_v8  ;;  %v749_v13 = vsel %vm424_vm10, %v747_v8, %v745_v11  ;;  %vm1388_vm10 = vmand %vm288_vm5, %vm290_vm6  ;;  %vm476_vm6 = vcmp.lt.s32.totalorder %v1027_v9, 124 }
 0x1a0   : > { %v1350_v16 = vsel %vm1252_vm11, %v749_v13, %v757_v14  ;;  %v1354_v17 = vsel %vm1256_vm12, %v748_v12, %v756_v15  ;;  %v311_v14 = vand.u32 15, %v1030_v10  ;;  %v304_v15 = vand.u32 15, %v1027_v9 }
 0x1a1   : > { %768 = vrot.lane.b32.xlu1 %v1350_v16, %s985_s19  ;;  %766 = vrot.lane.b32.xlu0 %v1354_v17, %s985_s19 }
 0x1a2   : > { %vm331_vm11 = vcmp.ge.s32.totalorder %v311_v14, 8  ;;  %vm333_vm12 = vcmp.lt.s32.totalorder %v311_v14, 12  ;;  %vm330_vm13 = vcmp.ge.s32.totalorder %v304_v15, 8  ;;  %vm332_vm14 = vcmp.lt.s32.totalorder %v304_v15, 12 }
 0x1a3   : > { %vm325_vm0 = vcmp.ge.s32.totalorder %v311_v14, 4  ;;  %vm1503_vm2 = vmand %vm331_vm11, %vm333_vm12  ;;  %vm324_vm3 = vcmp.ge.s32.totalorder %v304_v15, 4 }
 0x1a4   : > { %vm1507_vm5 = vmand %vm330_vm13, %vm332_vm14  ;;  %vm509_vm13 = vcmp.lt.s32.totalorder %v1027_v9, 2 }
 0x1a5   : > { %448 = vrot.lane.b32.xlu1 %v1276_v50, %s986_s20  ;;  %446 = vrot.lane.b32.xlu0 %v1280_v51, %s986_s20 }
 0x1a9   : > { %572 = vrot.lane.b32.xlu1 %v1302_v60, %s986_s20  ;;  %570 = vrot.lane.b32.xlu0 %v1306_v61, %s986_s20 }
 0x1ad   : > { %668 = vrot.lane.b32.xlu1 %v1328_v6, %s986_s20  ;;  %666 = vrot.lane.b32.xlu0 %v1332_v7, %s986_s20 }
 0x1b1   : > { %762 = vrot.lane.b32.xlu1 %v1350_v16, %s986_s20  ;;  %760 = vrot.lane.b32.xlu0 %v1354_v17, %s986_s20 }
 0x207   : > { %v456_v18 = vpop.permute.xlu1 %455  ;;  %v454_v19 = vpop.permute.xlu0 %453 }
 0x208   : > { %v458_v30 = vsel %vm457_vm1, %v454_v19, %v456_v18  ;;  %v459_v31 = vsel %vm457_vm1, %v456_v18, %v454_v19 }
 0x209   : > { %v465_v38 = vsel %vm1371_vm4, %v458_v30, %v1276_v50  ;;  %v464_v39 = vsel %vm1375_vm7, %v459_v31, %v1280_v51 }
 0x20b   : > { %v579_v20 = vpop.permute.xlu1 %578  ;;  %v577_v21 = vpop.permute.xlu0 %576 }
 0x20c   : > { %v580_v40 = vsel %vm457_vm1, %v577_v21, %v579_v20  ;;  %v581_v41 = vsel %vm457_vm1, %v579_v20, %v577_v21 }
 0x20d   : > { %v583_v48 = vsel %vm1371_vm4, %v580_v40, %v1302_v60  ;;  %v582_v49 = vsel %vm1375_vm7, %v581_v41, %v1306_v61 }
 0x20f   : > { %v675_v24 = vpop.permute.xlu1 %674  ;;  %v673_v25 = vpop.permute.xlu0 %672 }
 0x210   : > { %v676_v50 = vsel %vm457_vm1, %v673_v25, %v675_v24  ;;  %v677_v51 = vsel %vm457_vm1, %v675_v24, %v673_v25 }
 0x211   : > { %v679_v58 = vsel %vm1371_vm4, %v676_v50, %v1328_v6  ;;  %v678_v59 = vsel %vm1375_vm7, %v677_v51, %v1332_v7 }
 0x213   : > { %v769_v26 = vpop.permute.xlu1 %768  ;;  %v767_v27 = vpop.permute.xlu0 %766 }
 0x214   : > { %v770_v60 = vsel %vm457_vm1, %v767_v27, %v769_v26  ;;  %v771_v61 = vsel %vm457_vm1, %v769_v26, %v767_v27  ;;  %vm327_vm1 = vcmp.lt.s32.totalorder %v311_v14, 8 }
 0x215   : > { %v773_v4 = vsel %vm1371_vm4, %v770_v60, %v1350_v16  ;;  %v772_v5 = vsel %vm1375_vm7, %v771_v61, %v1354_v17  ;;  %vm326_vm4 = vcmp.lt.s32.totalorder %v304_v15, 8  ;;  %vm1516_vm7 = vmand %vm325_vm0, %vm327_vm1 }
 0x217   : > { %v449_v34 = vpop.permute.xlu1 %448  ;;  %v447_v35 = vpop.permute.xlu0 %446 }
 0x218   : > { %v451_v36 = vsel %vm450_vm8, %v447_v35, %v449_v34  ;;  %v452_v37 = vsel %vm450_vm8, %v449_v34, %v447_v35 }
 0x219   : > { %v1408_v42 = vsel %vm1384_vm9, %v452_v37, %v465_v38  ;;  %v1412_v43 = vsel %vm1388_vm10, %v451_v36, %v464_v39 }
 0x21a   : > { %481 = vrot.lane.b32.xlu1 %v1408_v42, %s987_s21  ;;  %479 = vrot.lane.b32.xlu0 %v1412_v43, %s987_s21 }
 0x21b   : > { %v573_v44 = vpop.permute.xlu1 %572  ;;  %v571_v45 = vpop.permute.xlu0 %570 }
 0x21c   : > { %v574_v46 = vsel %vm450_vm8, %v571_v45, %v573_v44  ;;  %v575_v47 = vsel %vm450_vm8, %v573_v44, %v571_v45 }
 0x21d   : > { %v1434_v52 = vsel %vm1384_vm9, %v575_v47, %v583_v48  ;;  %v1438_v53 = vsel %vm1388_vm10, %v574_v46, %v582_v49 }
 0x21e   : > { %594 = vrot.lane.b32.xlu1 %v1434_v52, %s987_s21  ;;  %592 = vrot.lane.b32.xlu0 %v1438_v53, %s987_s21 }
 0x21f   : > { %v669_v54 = vpop.permute.xlu1 %668  ;;  %v667_v55 = vpop.permute.xlu0 %666 }
 0x220   : > { %v670_v56 = vsel %vm450_vm8, %v667_v55, %v669_v54  ;;  %v671_v57 = vsel %vm450_vm8, %v669_v54, %v667_v55 }
 0x221   : > { %v1460_v62 = vsel %vm1384_vm9, %v671_v57, %v679_v58  ;;  %v1464_v63 = vsel %vm1388_vm10, %v670_v56, %v678_v59 }
 0x222   : > { %690 = vrot.lane.b32.xlu1 %v1460_v62, %s987_s21  ;;  %688 = vrot.lane.b32.xlu0 %v1464_v63, %s987_s21 }
 0x223   : > { %v763_v0 = vpop.permute.xlu1 %762  ;;  %v761_v1 = vpop.permute.xlu0 %760 }
 0x224   : > { %v764_v2 = vsel %vm450_vm8, %v761_v1, %v763_v0  ;;  %v765_v3 = vsel %vm450_vm8, %v763_v0, %v761_v1  ;;  %vm1520_vm8 = vmand %vm324_vm3, %vm326_vm4 }
 0x225   : > { %v1482_v6 = vsel %vm1384_vm9, %v765_v3, %v773_v4  ;;  %v1486_v7 = vsel %vm1388_vm10, %v764_v2, %v772_v5  ;;  %v340_v4 = vand.u32 7, %v1027_v9  ;;  %v347_v5 = vand.u32 7, %v1030_v10 }
 0x226   : > { %784 = vrot.lane.b32.xlu1 %v1482_v6, %s987_s21  ;;  %782 = vrot.lane.b32.xlu0 %v1486_v7, %s987_s21 }
 0x227   : > { %vm366_vm9 = vcmp.ge.s32.totalorder %v340_v4, 4  ;;  %vm368_vm10 = vcmp.lt.s32.totalorder %v340_v4, 6  ;;  %vm367_vm11 = vcmp.ge.s32.totalorder %v347_v5, 4  ;;  %vm369_vm12 = vcmp.lt.s32.totalorder %v347_v5, 6 }
 0x228   : > { %vm360_vm14 = vcmp.ge.s32.totalorder %v340_v4, 2  ;;  %vm1635_vm0 = vmand %vm366_vm9, %vm368_vm10  ;;  %vm361_vm1 = vcmp.ge.s32.totalorder %v347_v5, 2 }
 0x229   : > { %vm1639_vm3 = vmand %vm367_vm11, %vm369_vm12 }
 0x22a   : > { %474 = vrot.lane.b32.xlu1 %v1408_v42, %s988_s22  ;;  %472 = vrot.lane.b32.xlu0 %v1412_v43, %s988_s22 }
 0x22e   : > { %588 = vrot.lane.b32.xlu1 %v1434_v52, %s988_s22  ;;  %586 = vrot.lane.b32.xlu0 %v1438_v53, %s988_s22 }
 0x232   : > { %684 = vrot.lane.b32.xlu1 %v1460_v62, %s988_s22  ;;  %682 = vrot.lane.b32.xlu0 %v1464_v63, %s988_s22 }
 0x236   : > { %778 = vrot.lane.b32.xlu1 %v1482_v6, %s988_s22  ;;  %776 = vrot.lane.b32.xlu0 %v1486_v7, %s988_s22 }
 0x28c   : > { %v482_v8 = vpop.permute.xlu1 %481  ;;  %v480_v11 = vpop.permute.xlu0 %479 }
 0x28d   : > { %v484_v22 = vsel %vm483_vm15, %v480_v11, %v482_v8  ;;  %v485_v23 = vsel %vm483_vm15, %v482_v8, %v480_v11 }
 0x28e   : > { %v491_v30 = vsel %vm1503_vm2, %v484_v22, %v1408_v42  ;;  %v490_v31 = vsel %vm1507_vm5, %v485_v23, %v1412_v43 }
 0x290   : > { %v595_v12 = vpop.permute.xlu1 %594  ;;  %v593_v13 = vpop.permute.xlu0 %592 }
 0x291   : > { %v596_v32 = vsel %vm483_vm15, %v593_v13, %v595_v12  ;;  %v597_v33 = vsel %vm483_vm15, %v595_v12, %v593_v13 }
 0x292   : > { %v599_v40 = vsel %vm1503_vm2, %v596_v32, %v1434_v52  ;;  %v598_v41 = vsel %vm1507_vm5, %v597_v33, %v1438_v53 }
 0x294   : > { %v691_v16 = vpop.permute.xlu1 %690  ;;  %v689_v17 = vpop.permute.xlu0 %688 }
 0x295   : > { %v692_v42 = vsel %vm483_vm15, %v689_v17, %v691_v16  ;;  %v693_v43 = vsel %vm483_vm15, %v691_v16, %v689_v17 }
 0x296   : > { %v695_v50 = vsel %vm1503_vm2, %v692_v42, %v1460_v62  ;;  %v694_v51 = vsel %vm1507_vm5, %v693_v43, %v1464_v63 }
 0x298   : > { %v785_v18 = vpop.permute.xlu1 %784  ;;  %v783_v19 = vpop.permute.xlu0 %782 }
 0x299   : > { %v786_v52 = vsel %vm483_vm15, %v783_v19, %v785_v18  ;;  %v787_v53 = vsel %vm483_vm15, %v785_v18, %v783_v19  ;;  %vm362_vm15 = vcmp.lt.s32.totalorder %v340_v4, 4 }
 0x29a   : > { %v789_v60 = vsel %vm1503_vm2, %v786_v52, %v1482_v6  ;;  %v788_v61 = vsel %vm1507_vm5, %v787_v53, %v1486_v7  ;;  %vm363_vm2 = vcmp.lt.s32.totalorder %v347_v5, 4  ;;  %vm1647_vm4 = vmand %vm360_vm14, %vm362_vm15  ;;  %vm502_vm5 = vcmp.lt.s32.totalorder %v1027_v9, 126 }
 0x29c   : > { %v475_v26 = vpop.permute.xlu1 %474  ;;  %v473_v27 = vpop.permute.xlu0 %472 }
 0x29d   : > { %v477_v28 = vsel %vm476_vm6, %v473_v27, %v475_v26  ;;  %v478_v29 = vsel %vm476_vm6, %v475_v26, %v473_v27 }
 0x29e   : > { %v1540_v34 = vsel %vm1516_vm7, %v478_v29, %v491_v30  ;;  %v1544_v35 = vsel %vm1520_vm8, %v477_v28, %v490_v31 }
 0x29f   : > { %507 = vrot.lane.b32.xlu1 %v1540_v34, %s989_s23  ;;  %505 = vrot.lane.b32.xlu0 %v1544_v35, %s989_s23 }
 0x2a0   : > { %v589_v36 = vpop.permute.xlu1 %588  ;;  %v587_v37 = vpop.permute.xlu0 %586 }
 0x2a1   : > { %v590_v38 = vsel %vm476_vm6, %v587_v37, %v589_v36  ;;  %v591_v39 = vsel %vm476_vm6, %v589_v36, %v587_v37 }
 0x2a2   : > { %v1566_v44 = vsel %vm1516_vm7, %v591_v39, %v599_v40  ;;  %v1570_v45 = vsel %vm1520_vm8, %v590_v38, %v598_v41 }
 0x2a3   : > { %610 = vrot.lane.b32.xlu1 %v1566_v44, %s989_s23  ;;  %608 = vrot.lane.b32.xlu0 %v1570_v45, %s989_s23 }
 0x2a4   : > { %v685_v46 = vpop.permute.xlu1 %684  ;;  %v683_v47 = vpop.permute.xlu0 %682 }
 0x2a5   : > { %v686_v48 = vsel %vm476_vm6, %v683_v47, %v685_v46  ;;  %v687_v49 = vsel %vm476_vm6, %v685_v46, %v683_v47 }
 0x2a6   : > { %v1592_v54 = vsel %vm1516_vm7, %v687_v49, %v695_v50  ;;  %v1596_v55 = vsel %vm1520_vm8, %v686_v48, %v694_v51 }
 0x2a7   : > { %706 = vrot.lane.b32.xlu1 %v1592_v54, %s989_s23  ;;  %704 = vrot.lane.b32.xlu0 %v1596_v55, %s989_s23 }
 0x2a8   : > { %v779_v56 = vpop.permute.xlu1 %778  ;;  %v777_v57 = vpop.permute.xlu0 %776 }
 0x2a9   : > { %v780_v58 = vsel %vm476_vm6, %v777_v57, %v779_v56  ;;  %v781_v59 = vsel %vm476_vm6, %v779_v56, %v777_v57  ;;  %vm1652_vm6 = vmand %vm361_vm1, %vm363_vm2 }
 0x2aa   : > { %v1614_v62 = vsel %vm1516_vm7, %v781_v59, %v789_v60  ;;  %v1618_v63 = vsel %vm1520_vm8, %v780_v58, %v788_v61 }
 0x2ab   : > { %800 = vrot.lane.b32.xlu1 %v1614_v62, %s989_s23  ;;  %798 = vrot.lane.b32.xlu0 %v1618_v63, %s989_s23 }
 0x2af   : > { %500 = vrot.lane.b32.xlu1 %v1540_v34, %s990_s24  ;;  %498 = vrot.lane.b32.xlu0 %v1544_v35, %s990_s24 }
 0x2b3   : > { %604 = vrot.lane.b32.xlu1 %v1566_v44, %s990_s24  ;;  %602 = vrot.lane.b32.xlu0 %v1570_v45, %s990_s24 }
 0x2b7   : > { %700 = vrot.lane.b32.xlu1 %v1592_v54, %s990_s24  ;;  %698 = vrot.lane.b32.xlu0 %v1596_v55, %s990_s24 }
 0x2bb   : > { %794 = vrot.lane.b32.xlu1 %v1614_v62, %s990_s24  ;;  %792 = vrot.lane.b32.xlu0 %v1618_v63, %s990_s24 }
 0x311   : > { %v508_v0 = vpop.permute.xlu1 %507  ;;  %v506_v1 = vpop.permute.xlu0 %505 }
 0x312   : > { %v510_v13 = vsel %vm509_vm13, %v506_v1, %v508_v0  ;;  %v511_v14 = vsel %vm509_vm13, %v508_v0, %v506_v1 }
 0x313   : > { %v516_v19 = vsel %vm1635_vm0, %v511_v14, %v1544_v35  ;;  %v517_v20 = vsel %vm1639_vm3, %v510_v13, %v1540_v34 }
 0x315   : > { %v611_v2 = vpop.permute.xlu1 %610  ;;  %v609_v3 = vpop.permute.xlu0 %608 }
 0x316   : > { %v612_v23 = vsel %vm509_vm13, %v609_v3, %v611_v2  ;;  %v613_v24 = vsel %vm509_vm13, %v611_v2, %v609_v3 }
 0x317   : > { %v614_v29 = vsel %vm1635_vm0, %v613_v24, %v1570_v45  ;;  %v615_v30 = vsel %vm1639_vm3, %v612_v23, %v1566_v44 }
 0x319   : > { %v707_v6 = vpop.permute.xlu1 %706  ;;  %v705_v7 = vpop.permute.xlu0 %704 }
 0x31a   : > { %v708_v33 = vsel %vm509_vm13, %v705_v7, %v707_v6  ;;  %v709_v34 = vsel %vm509_vm13, %v707_v6, %v705_v7 }
 0x31b   : > { %v710_v39 = vsel %vm1635_vm0, %v709_v34, %v1596_v55  ;;  %v711_v40 = vsel %vm1639_vm3, %v708_v33, %v1592_v54 }
 0x31d   : > { %v801_v11 = vpop.permute.xlu1 %800  ;;  %v799_v12 = vpop.permute.xlu0 %798 }
 0x31e   : > { %v802_v43 = vsel %vm509_vm13, %v799_v12, %v801_v11  ;;  %v803_v44 = vsel %vm509_vm13, %v801_v11, %v799_v12 }
 0x31f   : > { %v804_v49 = vsel %vm1635_vm0, %v803_v44, %v1618_v63  ;;  %v805_v50 = vsel %vm1639_vm3, %v802_v43, %v1614_v62 }
 0x321   : > { %v501_v17 = vpop.permute.xlu1 %500  ;;  %v499_v18 = vpop.permute.xlu0 %498 }
 0x322   : > { %v503_v21 = vsel %vm502_vm5, %v499_v18, %v501_v17  ;;  %v504_v22 = vsel %vm502_vm5, %v501_v17, %v499_v18 }
 0x323   : > { %v522_v25 = vsel %vm1647_vm4, %v503_v21, %v516_v19  ;;  %v523_v26 = vsel %vm1652_vm6, %v504_v22, %v517_v20 }
 0x324   : > { %524 = vst [vmem:[%s1661_s27] sm:$0xff] %v522_v25  ;;  %525 = vst [vmem:[%s1661_s27 + $0x8] sm:$0xff] %v523_v26 }
 0x325   : > { %v605_v27 = vpop.permute.xlu1 %604  ;;  %v603_v28 = vpop.permute.xlu0 %602 }
 0x326   : > { %v606_v31 = vsel %vm502_vm5, %v603_v28, %v605_v27  ;;  %v607_v32 = vsel %vm502_vm5, %v605_v27, %v603_v28 }
 0x327   : > { %v616_v35 = vsel %vm1647_vm4, %v606_v31, %v614_v29  ;;  %v617_v36 = vsel %vm1652_vm6, %v607_v32, %v615_v30 }
 0x328   : > { %618 = vst [vmem:[%s1661_s27 + $0x10] sm:$0xff] %v616_v35  ;;  %619 = vst [vmem:[%s1661_s27 + $0x18] sm:$0xff] %v617_v36 }
 0x329   : > { %v701_v37 = vpop.permute.xlu1 %700  ;;  %v699_v38 = vpop.permute.xlu0 %698 }
 0x32a   : > { %v702_v41 = vsel %vm502_vm5, %v699_v38, %v701_v37  ;;  %v703_v42 = vsel %vm502_vm5, %v701_v37, %v699_v38 }
 0x32b   : > { %v712_v45 = vsel %vm1647_vm4, %v702_v41, %v710_v39  ;;  %v713_v46 = vsel %vm1652_vm6, %v703_v42, %v711_v40 }
 0x32c   : > { %714 = vst [vmem:[%s1661_s27 + $0x20] sm:$0xff] %v712_v45  ;;  %715 = vst [vmem:[%s1661_s27 + $0x28] sm:$0xff] %v713_v46 }
 0x32d   : > { %v795_v47 = vpop.permute.xlu1 %794  ;;  %v793_v48 = vpop.permute.xlu0 %792 }
 0x32e   : > { %v796_v51 = vsel %vm502_vm5, %v793_v48, %v795_v47  ;;  %v797_v52 = vsel %vm502_vm5, %v795_v47, %v793_v48 }
 0x32f   : > { %v806_v53 = vsel %vm1647_vm4, %v796_v51, %v804_v49  ;;  %v807_v54 = vsel %vm1652_vm6, %v797_v52, %v805_v50 }
 0x330   : > { %808 = vst [vmem:[%s1661_s27 + $0x30] sm:$0xff] %v806_v53  ;;  %809 = vst [vmem:[%s1661_s27 + $0x38] sm:$0xff] %v807_v54 }
 0x331 PF: > { %s11_s8 = sadd.s32 1, %s978_s8   ;;  %s1794_s6 = smov %s974_s7 }
 0x332   : > { %p8_p5 = scmp.ge.s32.totalorder %s11_s8, 6   ;;  %s1795_s7 = smov %s1797_s9 }
 0x334   :  { %10 = sbr.rel (!%p8_p5) target bundleno = 2 (0x2), region = 57 }

</bundles_post_ra>
